<compile_context>
chip_gen: v5e
topology: v5e:2x2
jax: 0.10.0
libtpu: 0.0.40
codegen_flags: <defaults>
</compile_context>

<pallas_src>
import functools

import jax
import jax.numpy as jnp
from jax.experimental import pallas as pl
from jax.experimental.pallas import tpu as pltpu

IN_DIM = 1000
PAD_IN = 1024          # 1000 zero-padded up to a lane/MXU-aligned multiple of 128
HID = 256
OUT_DIM = 256


def _round_up(n, m):
    return (n + m - 1) // m * m


def _elu_bf16(v_f32):
    # ELU, alpha=1.0 (PyTorch default).  The compare/select/sub run in bf16
    # (cheaper VALU epilogue on v6e/v7x); exp goes to the EUP (free slot).
    # TODO(synk): switch to expm1 if/when the Mosaic lowering guarantees it.
    v = v_f32.astype(jnp.bfloat16)
    return jnp.where(v > 0, v, jnp.exp(v) - 1.0)


def mlp_kernel(x_ref,
               w1_ref, b1_ref,
               w2_ref, b2_ref,
               w3_ref, b3_ref,
               w4_ref, b4_ref,
               o_ref):
    # x / weights are bf16 -> MXU runs at bf16 rate; accumulation is f32.
    x = x_ref[...]

    h = jnp.dot(x, w1_ref[...], preferred_element_type=jnp.float32) + b1_ref[...]
    h = _elu_bf16(h)
    h = jnp.dot(h, w2_ref[...], preferred_element_type=jnp.float32) + b2_ref[...]
    h = _elu_bf16(h)
    h = jnp.dot(h, w3_ref[...], preferred_element_type=jnp.float32) + b3_ref[...]
    h = _elu_bf16(h)
    h = jnp.dot(h, w4_ref[...], preferred_element_type=jnp.float32) + b4_ref[...]

    o_ref[...] = h.astype(o_ref.dtype)


def _choose_block(batch, block_b):
    """Pick the batch tile (rows per grid step)."""
    if batch <= 256:
        # Latency path: 16-row floor (bf16 sublane packing), no 128/256 over-pad.
        return max(16, _round_up(batch, 16))
    blk = min(block_b, _round_up(batch, 256))
    if _round_up(batch, blk) // blk < 2:
        # Guarantee >= 2 grid steps so v7x can shard the parallel batch axis
        # across both TensorCores.  Harmless on v5e/v6e (one extra ~0.35us step).
        blk = max(256, _round_up((batch + 1) // 2, 256))
    return blk


@functools.partial(jax.jit, static_argnames=("block_b",))
def deep_diffraction_embedder(x, params, block_b=1024):
    """x: [B, 1000] float32 -> [B, 256] float32."""
    B, D = x.shape
    assert D == IN_DIM
    (w1, b1), (w2, b2), (w3, b3), (w4, b4) = params

    eff_block = _choose_block(B, block_b)
    pad_b = _round_up(B, eff_block)

    # ---- wrapper-side layout prep ----------------------------------------
    # Feature pad 1000 -> 1024, batch pad, bf16 cast.  With allow_input_fusion
    # on operand 0 these fuse into the pallas_call input DMA instead of
    # writing an intermediate bf16 array to HBM.
    x_p = jnp.pad(x, ((0, pad_b - B), (0, PAD_IN - IN_DIM))).astype(jnp.bfloat16)

    w1_p = jnp.pad(w1, ((0, PAD_IN - IN_DIM), (0, 0))).astype(jnp.bfloat16)
    w2_b = w2.astype(jnp.bfloat16)
    w3_b = w3.astype(jnp.bfloat16)
    w4_b = w4.astype(jnp.bfloat16)
    b1f, b2f, b3f, b4f = (b.astype(jnp.float32) for b in (b1, b2, b3, b4))

    grid = (pad_b // eff_block,)

    # ---- specs -------------------------------------------------------------
    x_spec = pl.BlockSpec((eff_block, PAD_IN), lambda i: (i, 0))

    # Full-array weight / bias blocks; constant index_map keeps them resident
    # in VMEM across grid steps (~0.9 MB bf16 of weights).
    def full_spec(shape):
        return pl.BlockSpec(shape, lambda i: tuple(0 for _ in shape))

    in_specs = [
        x_spec,
        full_spec(w1_p.shape), full_spec(b1f.shape),
        full_spec(w2_b.shape), full_spec(b2f.shape),
        full_spec(w3_b.shape), full_spec(b3f.shape),
        full_spec(w4_b.shape), full_spec(b4f.shape),
    ]
    out_spec = pl.BlockSpec((eff_block, OUT_DIM), lambda i: (i, 0))

    weight_bytes = (PAD_IN * HID + 3 * HID * HID) * 2 + 4 * HID * 4
    cost = pl.CostEstimate(
        flops=2 * pad_b * (PAD_IN * HID + 3 * HID * HID),
        transcendentals=3 * pad_b * HID,              # ELU exp (negative branch)
        # x is read as f32 through the fused pad/cast producer.
        bytes_accessed=pad_b * IN_DIM * 4 + pad_b * OUT_DIM * 4 + weight_bytes,
    )

    out = pl.pallas_call(
        mlp_kernel,
        out_shape=jax.ShapeDtypeStruct((pad_b, OUT_DIM), jnp.float32),
        grid_spec=pltpu.PrefetchScalarGridSpec(
            num_scalar_prefetch=0,
            grid=grid,
            in_specs=in_specs,
            out_specs=out_spec,
        ),
        compiler_params=pltpu.CompilerParams(
            dimension_semantics=("parallel",),
            # Let XLA fuse the pad + bf16 cast into the x input DMA only.
            allow_input_fusion=[True] + [False] * 8,
            # Explicit limit: the 1024-row tile (~12-14 MB with double
            # buffering) can exceed v5e's 16 MiB scoped default; 48 MiB leaves
            # headroom under v7x's 64 MiB physical VMEM.
            vmem_limit_bytes=48 * 1024 * 1024,
        ),
        cost_estimate=cost,
    )(x_p, w1_p, b1f, w2_b, b2f, w3_b, b3f, w4_b, b4f)

    if pad_b != B:
        out = out[:B]
    return out


def init_params(key):
    """Deterministic synthetic parameters matching the nn.Linear shapes."""
    dims = [(IN_DIM, HID), (HID, HID), (HID, HID), (HID, OUT_DIM)]
    params = []
    for i, (d_in, d_out) in enumerate(dims):
        kw, kb = jax.random.split(jax.random.fold_in(key, i))
        bound = 1.0 / jnp.sqrt(d_in)
        # Stored [in, out]; PyTorch stores [out, in] but computes x @ W.T -> same math.
        w = jax.random.uniform(kw, (d_in, d_out), jnp.float32, -bound, bound)
        # Bias kept 2-D (1, out) so it is a lane-aligned VMEM tile in-kernel.
        b = jax.random.uniform(kb, (1, d_out), jnp.float32, -bound, bound)
        params.append((w, b))
    return tuple(params)


def reference_forward(x, params, mirror_kernel=False):
    """Pure-JAX reference. If mirror_kernel, mimic the kernel's bf16 dtypes."""
    h = x.astype(jnp.bfloat16) if mirror_kernel else x
    for i, (w, b) in enumerate(params):
        wc = w.astype(jnp.bfloat16) if mirror_kernel else w
        h = jnp.dot(h, wc, preferred_element_type=jnp.float32) + b
        if i < 3:
            if mirror_kernel:
                hb = h.astype(jnp.bfloat16)
                h = jnp.where(hb > 0, hb, jnp.exp(hb) - 1.0)
            else:
                h = jnp.where(h > 0, h, jnp.exp(h) - 1.0)
    return h.astype(jnp.float32)


if __name__ == "__main__":
    key = jax.random.PRNGKey(0)
    kx, kp = jax.random.split(key)

    batch = 8  # small test batch; wrapper pads to a 16-row tile internally
    x = jax.random.normal(kx, (batch, IN_DIM), jnp.float32)
    params = init_params(kp)

    out = deep_diffraction_embedder(x, params)
    out = jax.block_until_ready(out)

    assert out.shape == (batch, OUT_DIM), out.shape
    assert bool(jnp.all(jnp.isfinite(out)))

    # Tight check against a reference that mirrors the kernel's bf16 compute.
    ref_bf16 = reference_forward(x, params, mirror_kernel=True)
    err_bf16 = float(jnp.max(jnp.abs(out - ref_bf16)))
    assert err_bf16 < 5e-2, f"max abs err vs bf16-mirroring reference {err_bf16}"

    # Loose sanity check against the full-f32 reference (bf16 rounding only).
    ref_f32 = reference_forward(x, params, mirror_kernel=False)
    err_f32 = float(jnp.max(jnp.abs(out - ref_f32)))
    assert err_f32 < 2e-1, f"max abs err vs f32 reference {err_f32}"

    print("KERNEL_OK")
</pallas_src>

<mosaic_0001>
module attributes {stable_mosaic.version = 11 : i64} {
  func.func @mlp_kernel(%arg0: i32, %arg1: memref<16x1024xbf16, #tpu.memory_space<vmem>>, %arg2: memref<1024x256xbf16, #tpu.memory_space<vmem>>, %arg3: memref<1x256xf32, #tpu.memory_space<vmem>>, %arg4: memref<256x256xbf16, #tpu.memory_space<vmem>>, %arg5: memref<1x256xf32, #tpu.memory_space<vmem>>, %arg6: memref<256x256xbf16, #tpu.memory_space<vmem>>, %arg7: memref<1x256xf32, #tpu.memory_space<vmem>>, %arg8: memref<256x256xbf16, #tpu.memory_space<vmem>>, %arg9: memref<1x256xf32, #tpu.memory_space<vmem>>, %arg10: memref<16x256xf32, #tpu.memory_space<vmem>>) attributes {dimension_semantics = [#tpu.dimension_semantics<parallel>], iteration_bounds = array<i64: 1>, scalar_prefetch = 0 : i64, scratch_operands = 0 : i64, tpu.core_type = #tpu.core_type<tc>, window_params = [{transform_indices = @transform_0, window_bounds = array<i64: 16, 1024>}, {pipeline_mode = #tpu.pipeline_mode<synchronous>, transform_indices = @transform_1, window_bounds = array<i64: 1024, 256>}, {pipeline_mode = #tpu.pipeline_mode<synchronous>, transform_indices = @transform_2, window_bounds = array<i64: 1, 256>}, {pipeline_mode = #tpu.pipeline_mode<synchronous>, transform_indices = @transform_3, window_bounds = array<i64: 256, 256>}, {pipeline_mode = #tpu.pipeline_mode<synchronous>, transform_indices = @transform_4, window_bounds = array<i64: 1, 256>}, {pipeline_mode = #tpu.pipeline_mode<synchronous>, transform_indices = @transform_5, window_bounds = array<i64: 256, 256>}, {pipeline_mode = #tpu.pipeline_mode<synchronous>, transform_indices = @transform_6, window_bounds = array<i64: 1, 256>}, {pipeline_mode = #tpu.pipeline_mode<synchronous>, transform_indices = @transform_7, window_bounds = array<i64: 256, 256>}, {pipeline_mode = #tpu.pipeline_mode<synchronous>, transform_indices = @transform_8, window_bounds = array<i64: 1, 256>}, {transform_indices = @transform_9, window_bounds = array<i64: 16, 256>}]} {
    %c0 = arith.constant 0 : index
    %c0_0 = arith.constant 0 : index
    %0 = vector.load %arg1[%c0, %c0_0] : memref<16x1024xbf16, #tpu.memory_space<vmem>>, vector<16x1024xbf16>
    %c0_1 = arith.constant 0 : index
    %c0_2 = arith.constant 0 : index
    %1 = vector.load %arg2[%c0_1, %c0_2] : memref<1024x256xbf16, #tpu.memory_space<vmem>>, vector<1024x256xbf16>
    %cst = arith.constant dense<0.000000e+00> : vector<16x256xf32>
    %2 = tpu.matmul %0, %1, %cst {dimension_numbers = #tpu.dot_dimension_numbers<[1], [0], [0], [1], [0, 0, 1, 1], [], []>} : vector<16x1024xbf16>, vector<1024x256xbf16>, vector<16x256xf32> -> vector<16x256xf32>
    %c0_3 = arith.constant 0 : index
    %c0_4 = arith.constant 0 : index
    %3 = vector.load %arg3[%c0_3, %c0_4] : memref<1x256xf32, #tpu.memory_space<vmem>>, vector<1x256xf32>
    %4 = vector.broadcast %3 : vector<1x256xf32> to vector<16x256xf32>
    %5 = arith.addf %2, %4 : vector<16x256xf32>
    %6 = arith.truncf %5 : vector<16x256xf32> to vector<16x256xbf16>
    %cst_5 = arith.constant 0.000000e+00 : bf16
    %7 = vector.broadcast %cst_5 : bf16 to vector<16x256xbf16>
    %8 = arith.cmpf ogt, %6, %7 : vector<16x256xbf16>
    %9 = math.exp %6 : vector<16x256xbf16>
    %cst_6 = arith.constant 1.000000e+00 : bf16
    %10 = vector.broadcast %cst_6 : bf16 to vector<16x256xbf16>
    %11 = arith.subf %9, %10 : vector<16x256xbf16>
    %12 = arith.select %8, %6, %11 : vector<16x256xi1>, vector<16x256xbf16>
    %c0_7 = arith.constant 0 : index
    %c0_8 = arith.constant 0 : index
    %13 = vector.load %arg4[%c0_7, %c0_8] : memref<256x256xbf16, #tpu.memory_space<vmem>>, vector<256x256xbf16>
    %cst_9 = arith.constant dense<0.000000e+00> : vector<16x256xf32>
    %14 = tpu.matmul %12, %13, %cst_9 {dimension_numbers = #tpu.dot_dimension_numbers<[1], [0], [0], [1], [0, 0, 1, 1], [], []>} : vector<16x256xbf16>, vector<256x256xbf16>, vector<16x256xf32> -> vector<16x256xf32>
    %c0_10 = arith.constant 0 : index
    %c0_11 = arith.constant 0 : index
    %15 = vector.load %arg5[%c0_10, %c0_11] : memref<1x256xf32, #tpu.memory_space<vmem>>, vector<1x256xf32>
    %16 = vector.broadcast %15 : vector<1x256xf32> to vector<16x256xf32>
    %17 = arith.addf %14, %16 : vector<16x256xf32>
    %18 = arith.truncf %17 : vector<16x256xf32> to vector<16x256xbf16>
    %cst_12 = arith.constant 0.000000e+00 : bf16
    %19 = vector.broadcast %cst_12 : bf16 to vector<16x256xbf16>
    %20 = arith.cmpf ogt, %18, %19 : vector<16x256xbf16>
    %21 = math.exp %18 : vector<16x256xbf16>
    %cst_13 = arith.constant 1.000000e+00 : bf16
    %22 = vector.broadcast %cst_13 : bf16 to vector<16x256xbf16>
    %23 = arith.subf %21, %22 : vector<16x256xbf16>
    %24 = arith.select %20, %18, %23 : vector<16x256xi1>, vector<16x256xbf16>
    %c0_14 = arith.constant 0 : index
    %c0_15 = arith.constant 0 : index
    %25 = vector.load %arg6[%c0_14, %c0_15] : memref<256x256xbf16, #tpu.memory_space<vmem>>, vector<256x256xbf16>
    %cst_16 = arith.constant dense<0.000000e+00> : vector<16x256xf32>
    %26 = tpu.matmul %24, %25, %cst_16 {dimension_numbers = #tpu.dot_dimension_numbers<[1], [0], [0], [1], [0, 0, 1, 1], [], []>} : vector<16x256xbf16>, vector<256x256xbf16>, vector<16x256xf32> -> vector<16x256xf32>
    %c0_17 = arith.constant 0 : index
    %c0_18 = arith.constant 0 : index
    %27 = vector.load %arg7[%c0_17, %c0_18] : memref<1x256xf32, #tpu.memory_space<vmem>>, vector<1x256xf32>
    %28 = vector.broadcast %27 : vector<1x256xf32> to vector<16x256xf32>
    %29 = arith.addf %26, %28 : vector<16x256xf32>
    %30 = arith.truncf %29 : vector<16x256xf32> to vector<16x256xbf16>
    %cst_19 = arith.constant 0.000000e+00 : bf16
    %31 = vector.broadcast %cst_19 : bf16 to vector<16x256xbf16>
    %32 = arith.cmpf ogt, %30, %31 : vector<16x256xbf16>
    %33 = math.exp %30 : vector<16x256xbf16>
    %cst_20 = arith.constant 1.000000e+00 : bf16
    %34 = vector.broadcast %cst_20 : bf16 to vector<16x256xbf16>
    %35 = arith.subf %33, %34 : vector<16x256xbf16>
    %36 = arith.select %32, %30, %35 : vector<16x256xi1>, vector<16x256xbf16>
    %c0_21 = arith.constant 0 : index
    %c0_22 = arith.constant 0 : index
    %37 = vector.load %arg8[%c0_21, %c0_22] : memref<256x256xbf16, #tpu.memory_space<vmem>>, vector<256x256xbf16>
    %cst_23 = arith.constant dense<0.000000e+00> : vector<16x256xf32>
    %38 = tpu.matmul %36, %37, %cst_23 {dimension_numbers = #tpu.dot_dimension_numbers<[1], [0], [0], [1], [0, 0, 1, 1], [], []>} : vector<16x256xbf16>, vector<256x256xbf16>, vector<16x256xf32> -> vector<16x256xf32>
    %c0_24 = arith.constant 0 : index
    %c0_25 = arith.constant 0 : index
    %39 = vector.load %arg9[%c0_24, %c0_25] : memref<1x256xf32, #tpu.memory_space<vmem>>, vector<1x256xf32>
    %40 = vector.broadcast %39 : vector<1x256xf32> to vector<16x256xf32>
    %41 = arith.addf %38, %40 : vector<16x256xf32>
    %c0_26 = arith.constant 0 : index
    %c0_27 = arith.constant 0 : index
    %42 = vector.load %arg10[%c0_26, %c0_27] : memref<16x256xf32, #tpu.memory_space<vmem>>, vector<16x256xf32>
    tpu.vector_store %arg10[%c0_26, %c0_27], %41 {strides = array<i32>} : memref<16x256xf32, #tpu.memory_space<vmem>>, vector<16x256xf32>,
    return
  }
  func.func @transform_0(%arg0: i32) -> (i32, i32) {
    %c0_i32 = arith.constant 0 : i32
    %c0_i32_0 = arith.constant 0 : i32
    return %arg0, %c0_i32 : i32, i32
  }
  func.func @transform_1(%arg0: i32) -> (i32, i32) {
    %c0_i32 = arith.constant 0 : i32
    %c0_i32_0 = arith.constant 0 : i32
    %c0_i32_1 = arith.constant 0 : i32
    return %c0_i32, %c0_i32_0 : i32, i32
  }
  func.func @transform_2(%arg0: i32) -> (i32, i32) {
    %c0_i32 = arith.constant 0 : i32
    %c0_i32_0 = arith.constant 0 : i32
    %c0_i32_1 = arith.constant 0 : i32
    return %c0_i32, %c0_i32_0 : i32, i32
  }
  func.func @transform_3(%arg0: i32) -> (i32, i32) {
    %c0_i32 = arith.constant 0 : i32
    %c0_i32_0 = arith.constant 0 : i32
    %c0_i32_1 = arith.constant 0 : i32
    return %c0_i32, %c0_i32_0 : i32, i32
  }
  func.func @transform_4(%arg0: i32) -> (i32, i32) {
    %c0_i32 = arith.constant 0 : i32
    %c0_i32_0 = arith.constant 0 : i32
    %c0_i32_1 = arith.constant 0 : i32
    return %c0_i32, %c0_i32_0 : i32, i32
  }
  func.func @transform_5(%arg0: i32) -> (i32, i32) {
    %c0_i32 = arith.constant 0 : i32
    %c0_i32_0 = arith.constant 0 : i32
    %c0_i32_1 = arith.constant 0 : i32
    return %c0_i32, %c0_i32_0 : i32, i32
  }
  func.func @transform_6(%arg0: i32) -> (i32, i32) {
    %c0_i32 = arith.constant 0 : i32
    %c0_i32_0 = arith.constant 0 : i32
    %c0_i32_1 = arith.constant 0 : i32
    return %c0_i32, %c0_i32_0 : i32, i32
  }
  func.func @transform_7(%arg0: i32) -> (i32, i32) {
    %c0_i32 = arith.constant 0 : i32
    %c0_i32_0 = arith.constant 0 : i32
    %c0_i32_1 = arith.constant 0 : i32
    return %c0_i32, %c0_i32_0 : i32, i32
  }
  func.func @transform_8(%arg0: i32) -> (i32, i32) {
    %c0_i32 = arith.constant 0 : i32
    %c0_i32_0 = arith.constant 0 : i32
    %c0_i32_1 = arith.constant 0 : i32
    return %c0_i32, %c0_i32_0 : i32, i32
  }
  func.func @transform_9(%arg0: i32) -> (i32, i32) {
    %c0_i32 = arith.constant 0 : i32
    %c0_i32_0 = arith.constant 0 : i32
    return %arg0, %c0_i32 : i32, i32
  }
}

</mosaic_0001>

<bundles_post_ra>
// kernel: deep_diffraction_embedder.2
= control target key start
LH: loop header
LB: loop body
LE: loop exit
PB: predicated region body
PF: predicated region fallthrough
CT: control target
= control target key end

     0   :  { %s4993_s0 = inlined_call_operand.vmem [shape: bf16[1024,256], index: 0, kind: input, shape index: {}]   ;;  %s4994_s1 = inlined_call_operand.vmem [shape: f32[1,256], index: 1, kind: input, shape index: {}]   ;;  %s4995_s2 = inlined_call_operand.vmem [shape: bf16[256,256], index: 2, kind: input, shape index: {}]   ;;  %s4996_s3 = inlined_call_operand.vmem [shape: f32[1,256], index: 3, kind: input, shape index: {}]   ;;  %s4997_s4 = inlined_call_operand.vmem [shape: bf16[256,256], index: 4, kind: input, shape index: {}]   ;;  %s4998_s5 = inlined_call_operand.vmem [shape: f32[1,256], index: 5, kind: input, shape index: {}]   ;;  %s4999_s6 = inlined_call_operand.vmem [shape: bf16[256,256], index: 6, kind: input, shape index: {}]   ;;  %s5000_s7 = inlined_call_operand.vmem [shape: f32[1,256], index: 7, kind: input, shape index: {}]   ;;  %s5001_s8 = inlined_call_operand.vmem [shape: bf16[8,1000], index: 8, kind: input, shape index: {}]   ;;  %s5002_s9 = inlined_call_operand.<no memory space> [shape: bf16[], index: 9, kind: input, shape index: {}]   ;;  %s5003_s10 = inlined_call_operand.vmem [shape: f32[16,256], index: 10, kind: output, shape index: {}]  }
   0x1   :  { %v15_v0 = vstv %s5002_s9 }
   0x2   :  { %v3509_v1 = vunpack.i.l.bf16 %v15_v0 }
   0x3   :  { %v2305_v2 = vld [vmem:[%s4993_s0 + $0x70] sm:$0xf]  ;;  %v3178_v3 = vld [vmem:[%s4993_s0 + $0x74] sm:$0xf0]  ;;  %v2297_v13 = vld [vmem:[%s4993_s0 + $0x60] sm:$0xf] }
   0x4   :  { %v2369_v4 = vld [vmem:[%s4993_s0 + $0xf0] sm:$0xf]  ;;  %v2306_v5 = vor.u32 %v3178_v3, %v2305_v2  ;;  %v3194_v6 = vld [vmem:[%s4993_s0 + $0xf4] sm:$0xf0]  ;;  %v3176_v15 = vld [vmem:[%s4993_s0 + $0x64] sm:$0xf0] }
   0x5   :  { %v2433_v7 = vld [vmem:[%s4993_s0 + $0x170] sm:$0xf]  ;;  %v3210_v8 = vld [vmem:[%s4993_s0 + $0x174] sm:$0xf0]  ;;  %v2370_v9 = vor.u32 %v3194_v6, %v2369_v4  ;;  %v2361_v16 = vld [vmem:[%s4993_s0 + $0xe0] sm:$0xf]  ;;  %v2298_v18 = vor.u32 %v3176_v15, %v2297_v13 }
   0x6   :  { %v2434_v10 = vor.u32 %v3210_v8, %v2433_v7  ;;  %v2497_v11 = vld [vmem:[%s4993_s0 + $0x1f0] sm:$0xf]  ;;  %v3226_v12 = vld [vmem:[%s4993_s0 + $0x1f4] sm:$0xf0]  ;;  %1082 = vmatpush.bf16.msra.mxu0 %v2306_v5  ;;  %v3192_v17 = vld [vmem:[%s4993_s0 + $0xe4] sm:$0xf0] }
   0x7   :  { %v2498_v14 = vor.u32 %v3226_v12, %v2497_v11  ;;  %1096 = vmatpush.bf16.msra.mxu1 %v2370_v9  ;;  %v2362_v19 = vor.u32 %v3192_v17, %v2361_v16  ;;  %v2425_v20 = vld [vmem:[%s4993_s0 + $0x160] sm:$0xf]  ;;  %v3208_v21 = vld [vmem:[%s4993_s0 + $0x164] sm:$0xf0]  ;;  %v2289_v25 = vld [vmem:[%s4993_s0 + $0x50] sm:$0xf] }
   0x8   :  { %1110 = vmatpush.bf16.msra.mxu2 %v2434_v10  ;;  %v2489_v22 = vld [vmem:[%s4993_s0 + $0x1e0] sm:$0xf]  ;;  %v2426_v23 = vor.u32 %v3208_v21, %v2425_v20  ;;  %v3224_v24 = vld [vmem:[%s4993_s0 + $0x1e4] sm:$0xf0]  ;;  %v3174_v26 = vld [vmem:[%s4993_s0 + $0x54] sm:$0xf0] }
   0x9   :  { %1124 = vmatpush.bf16.msra.mxu3 %v2498_v14  ;;  %v2490_v27 = vor.u32 %v3224_v24, %v2489_v22  ;;  %v2353_v28 = vld [vmem:[%s4993_s0 + $0xd0] sm:$0xf]  ;;  %v3190_v29 = vld [vmem:[%s4993_s0 + $0xd4] sm:$0xf0]  ;;  %v2290_v31 = vor.u32 %v3174_v26, %v2289_v25  ;;  %v2281_v37 = vld [vmem:[%s4993_s0 + $0x40] sm:$0xf] }
   0xa   :  { %v2417_v30 = vld [vmem:[%s4993_s0 + $0x150] sm:$0xf]  ;;  %1083 = vmatpush.bf16.msra.mxu0 %v2298_v18  ;;  %v3206_v32 = vld [vmem:[%s4993_s0 + $0x154] sm:$0xf0]  ;;  %v2354_v35 = vor.u32 %v3190_v29, %v2353_v28  ;;  %v3172_v38 = vld [vmem:[%s4993_s0 + $0x44] sm:$0xf0] }
   0xb   :  { %v2481_v33 = vld [vmem:[%s4993_s0 + $0x1d0] sm:$0xf]  ;;  %v3222_v34 = vld [vmem:[%s4993_s0 + $0x1d4] sm:$0xf0]  ;;  %1097 = vmatpush.bf16.msra.mxu1 %v2362_v19  ;;  %v2418_v36 = vor.u32 %v3206_v32, %v2417_v30  ;;  %v2345_v39 = vld [vmem:[%s4993_s0 + $0xc0] sm:$0xf]  ;;  %v2282_v46 = vor.u32 %v3172_v38, %v2281_v37 }
   0xc   :  { %1111 = vmatpush.bf16.msra.mxu2 %v2426_v23  ;;  %v2482_v40 = vor.u32 %v3222_v34, %v2481_v33  ;;  %v3188_v41 = vld [vmem:[%s4993_s0 + $0xc4] sm:$0xf0]  ;;  %v2409_v42 = vld [vmem:[%s4993_s0 + $0x140] sm:$0xf]  ;;  %v2273_v49 = vld [vmem:[%s4993_s0 + $0x30] sm:$0xf] }
   0xd   :  { %1125 = vmatpush.bf16.msra.mxu3 %v2490_v27  ;;  %v3204_v43 = vld [vmem:[%s4993_s0 + $0x144] sm:$0xf0]  ;;  %v2473_v44 = vld [vmem:[%s4993_s0 + $0x1c0] sm:$0xf]  ;;  %v2346_v47 = vor.u32 %v3188_v41, %v2345_v39  ;;  %v3170_v50 = vld [vmem:[%s4993_s0 + $0x34] sm:$0xf0] }
   0xe   :  { %v3220_v45 = vld [vmem:[%s4993_s0 + $0x1c4] sm:$0xf0]  ;;  %1084 = vmatpush.bf16.msra.mxu0 %v2290_v31  ;;  %v2410_v48 = vor.u32 %v3204_v43, %v2409_v42  ;;  %v2337_v51 = vld [vmem:[%s4993_s0 + $0xb0] sm:$0xf]  ;;  %v3186_v53 = vld [vmem:[%s4993_s0 + $0xb4] sm:$0xf0]  ;;  %v2274_v58 = vor.u32 %v3170_v50, %v2273_v49  ;;  %v3400_v42 = vpack.c.bf16 %v3509_v1, %v3509_v1 }
   0xf   :  { %1098 = vmatpush.bf16.msra.mxu1 %v2354_v35  ;;  %v2474_v52 = vor.u32 %v3220_v45, %v2473_v44  ;;  %v2401_v54 = vld [vmem:[%s4993_s0 + $0x130] sm:$0xf]  ;;  %v3202_v55 = vld [vmem:[%s4993_s0 + $0x134] sm:$0xf0]  ;;  %v2338_v59 = vor.u32 %v3186_v53, %v2337_v51  ;;  %v2265_v61 = vld [vmem:[%s4993_s0 + $0x20] sm:$0xf] }
  0x10   :  { %1112 = vmatpush.bf16.msra.mxu2 %v2418_v36  ;;  %v2465_v56 = vld [vmem:[%s4993_s0 + $0x1b0] sm:$0xf]  ;;  %v3218_v57 = vld [vmem:[%s4993_s0 + $0x1b4] sm:$0xf0]  ;;  %v2402_v60 = vor.u32 %v3202_v55, %v2401_v54  ;;  %v3168_v62 = vld [vmem:[%s4993_s0 + $0x24] sm:$0xf0] }
  0x11   :  { %1126 = vmatpush.bf16.msra.mxu3 %v2482_v40  ;;  %v2329_v63 = vld [vmem:[%s4993_s0 + $0xa0] sm:$0xf]  ;;  %v2466_v0 = vor.u32 %v3218_v57, %v2465_v56  ;;  %v3184_v2 = vld [vmem:[%s4993_s0 + $0xa4] sm:$0xf0]  ;;  %v2266_v7 = vor.u32 %v3168_v62, %v2265_v61  ;;  %v2257_v10 = vld [vmem:[%s4993_s0 + $0x10] sm:$0xf] }
  0x12   :  { %1085 = vmatpush.bf16.msra.mxu0 %v2282_v46  ;;  %v2393_v3 = vld [vmem:[%s4993_s0 + $0x120] sm:$0xf]  ;;  %v3200_v4 = vld [vmem:[%s4993_s0 + $0x124] sm:$0xf0]  ;;  %v2330_v8 = vor.u32 %v3184_v2, %v2329_v63  ;;  %v3166_v11 = vld [vmem:[%s4993_s0 + $0x14] sm:$0xf0] }
  0x13   :  { %1099 = vmatpush.bf16.msra.mxu1 %v2346_v47  ;;  %v2457_v5 = vld [vmem:[%s4993_s0 + $0x1a0] sm:$0xf]  ;;  %v3216_v6 = vld [vmem:[%s4993_s0 + $0x1a4] sm:$0xf0]  ;;  %v2394_v9 = vor.u32 %v3200_v4, %v2393_v3  ;;  %v2321_v12 = vld [vmem:[%s4993_s0 + $0x90] sm:$0xf]  ;;  %v2258_v19 = vor.u32 %v3166_v11, %v2257_v10 }
  0x14   :  { %1113 = vmatpush.bf16.msra.mxu2 %v2410_v48  ;;  %v2458_v13 = vor.u32 %v3216_v6, %v2457_v5  ;;  %v3182_v14 = vld [vmem:[%s4993_s0 + $0x94] sm:$0xf0]  ;;  %v2385_v15 = vld [vmem:[%s4993_s0 + $0x110] sm:$0xf]  ;;  %v2249_v20 = vld [vmem:[%s4993_s0] sm:$0xf] }
  0x15   :  { %1127 = vmatpush.bf16.msra.mxu3 %v2474_v52  ;;  %v3198_v16 = vld [vmem:[%s4993_s0 + $0x114] sm:$0xf0]  ;;  %v2449_v17 = vld [vmem:[%s4993_s0 + $0x190] sm:$0xf]  ;;  %v3164_v21 = vld [vmem:[%s4993_s0 + $0x4] sm:$0xf0]  ;;  %v2322_v22 = vor.u32 %v3182_v14, %v2321_v12  ;;  %v210_v12 = vlaneseq }
  0x16   :  { %1086 = vmatpush.bf16.msra.mxu0 %v2274_v58  ;;  %v3214_v18 = vld [vmem:[%s4993_s0 + $0x194] sm:$0xf0]  ;;  %v2386_v23 = vor.u32 %v3198_v16, %v2385_v15  ;;  %v2313_v24 = vld [vmem:[%s4993_s0 + $0x80] sm:$0xf]  ;;  %v3180_v25 = vld [vmem:[%s4993_s0 + $0x84] sm:$0xf0]  ;;  %v2250_v34 = vor.u32 %v3164_v21, %v2249_v20 }
  0x17   :  { %1100 = vmatpush.bf16.msra.mxu1 %v2338_v59  ;;  %v2377_v26 = vld [vmem:[%s4993_s0 + $0x100] sm:$0xf]  ;;  %v2450_v27 = vor.u32 %v3214_v18, %v2449_v17  ;;  %v3196_v28 = vld [vmem:[%s4993_s0 + $0x104] sm:$0xf0]  ;;  %v2561_v31 = vld [vmem:[%s4993_s0 + $0x270] sm:$0xf]  ;;  %v2314_v38 = vor.u32 %v3180_v25, %v2313_v24 }
  0x18   :  { %1114 = vmatpush.bf16.msra.mxu2 %v2402_v60  ;;  %v2441_v29 = vld [vmem:[%s4993_s0 + $0x180] sm:$0xf]  ;;  %v3212_v30 = vld [vmem:[%s4993_s0 + $0x184] sm:$0xf0]  ;;  %v3242_v32 = vld [vmem:[%s4993_s0 + $0x274] sm:$0xf0]  ;;  %v2378_v39 = vor.u32 %v3196_v28, %v2377_v26 }
  0x19   :  { %1128 = vmatpush.bf16.msra.mxu3 %v2466_v0  ;;  %v2625_v33 = vld [vmem:[%s4993_s0 + $0x2f0] sm:$0xf]  ;;  %v3258_v35 = vld [vmem:[%s4993_s0 + $0x2f4] sm:$0xf0]  ;;  %v2442_v43 = vor.u32 %v3212_v30, %v2441_v29  ;;  %v2562_v44 = vor.u32 %v3242_v32, %v2561_v31  ;;  %v2553_v45 = vld [vmem:[%s4993_s0 + $0x260] sm:$0xf] }
  0x1a   :  { %1087 = vmatpush.bf16.msra.mxu0 %v2266_v7  ;;  %v2689_v36 = vld [vmem:[%s4993_s0 + $0x370] sm:$0xf]  ;;  %v3274_v37 = vld [vmem:[%s4993_s0 + $0x374] sm:$0xf0]  ;;  %v3240_v46 = vld [vmem:[%s4993_s0 + $0x264] sm:$0xf0]  ;;  %v2626_v47 = vor.u32 %v3258_v35, %v2625_v33 }
  0x1b   :  { %1101 = vmatpush.bf16.msra.mxu1 %v2330_v8  ;;  %v2753_v40 = vld [vmem:[%s4993_s0 + $0x3f0] sm:$0xf]  ;;  %v3290_v41 = vld [vmem:[%s4993_s0 + $0x3f4] sm:$0xf0]  ;;  %v2690_v48 = vor.u32 %v3274_v37, %v2689_v36  ;;  %v2617_v49 = vld [vmem:[%s4993_s0 + $0x2e0] sm:$0xf]  ;;  %v2554_v59 = vor.u32 %v3240_v46, %v2553_v45 }
  0x1c   :  { %1115 = vmatpush.bf16.msra.mxu2 %v2394_v9  ;;  %v3256_v50 = vld [vmem:[%s4993_s0 + $0x2e4] sm:$0xf0]  ;;  %v2681_v51 = vld [vmem:[%s4993_s0 + $0x360] sm:$0xf]  ;;  %v2754_v52 = vor.u32 %v3290_v41, %v2753_v40  ;;  %v2545_v56 = vld [vmem:[%s4993_s0 + $0x250] sm:$0xf] }
  0x1d   :  { %1129 = vmatpush.bf16.msra.mxu3 %v2458_v13  ;;  %v3272_v53 = vld [vmem:[%s4993_s0 + $0x364] sm:$0xf0]  ;;  %v2745_v54 = vld [vmem:[%s4993_s0 + $0x3e0] sm:$0xf]  ;;  %v3238_v57 = vld [vmem:[%s4993_s0 + $0x254] sm:$0xf0]  ;;  %v2618_v63 = vor.u32 %v3256_v50, %v2617_v49 }
  0x1e   :  { %1088 = vmatpush.bf16.msra.mxu0 %v2258_v19  ;;  %v3288_v55 = vld [vmem:[%s4993_s0 + $0x3e4] sm:$0xf0]  ;;  %v47_v58 = vld [vmem:[%s5001_s8] sm:$0xff]   ;;  %3401 = vst [vmem:[#allocation7 + $0x20] sm:$0xff] %v3400_v42   ;;  %v2609_v60 = vld [vmem:[%s4993_s0 + $0x2d0] sm:$0xf]  ;;  %v2682_v0 = vor.u32 %v3272_v53, %v2681_v51  ;;  %v2546_v9 = vor.u32 %v3238_v57, %v2545_v56 }
  0x1f   :  { %1102 = vmatpush.bf16.msra.mxu1 %v2322_v22  ;;  %v3254_v61 = vld [vmem:[%s4993_s0 + $0x2d4] sm:$0xf0]  ;;  %58 = vst [vmem:[#allocation7] sm:$0xff] %v47_v58   ;;  %v3425_v62 = vld [vmem:[%s5001_s8 + $0x8] sm:$0xff]  ;;  %v2673_v2 = vld [vmem:[%s4993_s0 + $0x350] sm:$0xf]  ;;  %v2746_v4 = vor.u32 %v3288_v55, %v2745_v54 }
  0x20   :  { %1116 = vmatpush.bf16.msra.mxu2 %v2386_v23  ;;  %v3270_v3 = vld [vmem:[%s4993_s0 + $0x354] sm:$0xf0]  ;;  %3406 = vst [vmem:[#allocation7 + $0x28] sm:$0xff] %v3400_v42   ;;  %v2737_v5 = vld [vmem:[%s4993_s0 + $0x3d0] sm:$0xf]  ;;  %v2610_v13 = vor.u32 %v3254_v61, %v2609_v60  ;;  %v211_v30 = vand.u32 127, %v210_v12 }
  0x21   :  { %1130 = vmatpush.bf16.msra.mxu3 %v2450_v27  ;;  %v3286_v6 = vld [vmem:[%s4993_s0 + $0x3d4] sm:$0xf0]  ;;  %3411 = vst [vmem:[#allocation7 + $0x30] sm:$0xff] %v3400_v42   ;;  %v2537_v7 = vld [vmem:[%s4993_s0 + $0x240] sm:$0xf]  ;;  %v2674_v14 = vor.u32 %v3270_v3, %v2673_v2  ;;  %v3426_v46 = vld [vmem:[%s5001_s8 + $0x10] sm:$0xff] }
  0x22   :  { %1089 = vmatpush.bf16.msra.mxu0 %v2250_v34  ;;  %v3236_v8 = vld [vmem:[%s4993_s0 + $0x244] sm:$0xf0]  ;;  %3416 = vst [vmem:[#allocation7 + $0x38] sm:$0xff] %v3400_v42   ;;  %v2601_v10 = vld [vmem:[%s4993_s0 + $0x2c0] sm:$0xf]  ;;  %v2738_v18 = vor.u32 %v3286_v6, %v2737_v5 }
  0x23   :  { %1103 = vmatpush.bf16.msra.mxu1 %v2314_v38  ;;  %v3252_v11 = vld [vmem:[%s4993_s0 + $0x2c4] sm:$0xf0]  ;;  %3391 = vst [vmem:[#allocation7 + $0x8] sm:$0xff] %v3425_v62   ;;  %v2665_v15 = vld [vmem:[%s4993_s0 + $0x340] sm:$0xf]  ;;  %v2538_v25 = vor.u32 %v3236_v8, %v2537_v7 }
  0x24   :  { %1117 = vmatpush.bf16.msra.mxu2 %v2378_v39  ;;  %v3268_v16 = vld [vmem:[%s4993_s0 + $0x344] sm:$0xf0]  ;;  %v2729_v17 = vld [vmem:[%s4993_s0 + $0x3c0] sm:$0xf]  ;;  %v2529_v23 = vld [vmem:[%s4993_s0 + $0x230] sm:$0xf]  ;;  %v2602_v31 = vor.u32 %v3252_v11, %v2601_v10 }
  0x25   :  { %1131 = vmatpush.bf16.msra.mxu3 %v2442_v43  ;;  %v3284_v19 = vld [vmem:[%s4993_s0 + $0x3c4] sm:$0xf0]  ;;  %v3159_v20 = vld [vmem:[#allocation7 + $0x1c] sm:$0xf0]  ;;  %v2219_v21 = vld [vmem:[#allocation7 + $0x20] sm:$0xf0]  ;;  %v2666_v32 = vor.u32 %v3268_v16, %v2665_v15 }
  0x26   :  { %1138 = vmatpush.bf16.msrb.mxu0 %v2562_v44  ;;  %v2217_v22 = vld [vmem:[#allocation7] sm:$0xf]  ;;  %v3155_v24 = vld [vmem:[#allocation7 + $0x4] sm:$0xf]  ;;  %v3234_v27 = vld [vmem:[%s4993_s0 + $0x234] sm:$0xf0]  ;;  %v2730_v36 = vor.u32 %v3284_v19, %v2729_v17 }
  0x27   :  { %1152 = vmatpush.bf16.msrb.mxu1 %v2626_v47  ;;  %v3810_v26 = vor.u32 %v3159_v20, %v2217_v22  ;;  %v2593_v28 = vld [vmem:[%s4993_s0 + $0x2b0] sm:$0xf]  ;;  %v3818_v29 = vor.u32 %v3155_v24, %v2219_v21  ;;  %v3160_v33 = vld [vmem:[#allocation7 + $0x24] sm:$0xf0]  ;;  %v3250_v34 = vld [vmem:[%s4993_s0 + $0x2b4] sm:$0xf0]  ;;  %v2530_v44 = vor.u32 %v3234_v27, %v2529_v23 }
  0x28   :  { %1166 = vmatpush.bf16.msrb.mxu2 %v2690_v48  ;;  %v2227_v35 = vld [vmem:[#allocation7 + $0x28] sm:$0xf0]  ;;  %v2657_v37 = vld [vmem:[%s4993_s0 + $0x330] sm:$0xf]  ;;  %v3266_v38 = vld [vmem:[%s4993_s0 + $0x334] sm:$0xf0]  ;;  %v2594_v48 = vor.u32 %v3250_v34, %v2593_v28 }
  0x29   :  { %1180 = vmatpush.bf16.msrb.mxu3 %v2754_v52  ;;  %1090 = vmatmul.bf16.vlgmr.msra.gmra.mxu0 %v3810_v26  ;;  %v2721_v39 = vld [vmem:[%s4993_s0 + $0x3b0] sm:$0xf]  ;;  %v3282_v41 = vld [vmem:[%s4993_s0 + $0x3b4] sm:$0xf0]  ;;  %v212_v47 = vadd.s32 896, %v211_v30  ;;  %v2658_v49 = vor.u32 %v3266_v38, %v2657_v37  ;;  %3396 = vst [vmem:[#allocation7 + $0x10] sm:$0xff] %v3426_v46  }
  0x2a   :  { %1139 = vmatpush.bf16.msrb.mxu0 %v2554_v59  ;;  %v2225_v40 = vld [vmem:[#allocation7 + $0x8] sm:$0xf]  ;;  %1104 = vmatmul.bf16.vlgmr.msra.gmra.mxu1 %v3818_v29  ;;  %v3156_v42 = vld [vmem:[#allocation7 + $0xc] sm:$0xf]  ;;  %v2521_v50 = vld [vmem:[%s4993_s0 + $0x220] sm:$0xf]  ;;  %v2722_v53 = vor.u32 %v3282_v41, %v2721_v39 }
  0x2b   :  { %1153 = vmatpush.bf16.msrb.mxu1 %v2618_v63  ;;  %v3837_v43 = vor.u32 %v3160_v33, %v2225_v40  ;;  %v3839_v45 = vor.u32 %v3156_v42, %v2227_v35  ;;  %v3232_v51 = vld [vmem:[%s4993_s0 + $0x224] sm:$0xf0]  ;;  %v2585_v52 = vld [vmem:[%s4993_s0 + $0x2a0] sm:$0xf]  ;;  %v2513_v59 = vld [vmem:[%s4993_s0 + $0x210] sm:$0xf] }
  0x2c   :  { %1167 = vmatpush.bf16.msrb.mxu2 %v2682_v0  ;;  %v3248_v54 = vld [vmem:[%s4993_s0 + $0x2a4] sm:$0xf0]  ;;  %v2649_v55 = vld [vmem:[%s4993_s0 + $0x320] sm:$0xf]  ;;  %v2522_v60 = vor.u32 %v3232_v51, %v2521_v50  ;;  %v3230_v61 = vld [vmem:[%s4993_s0 + $0x214] sm:$0xf0] }
  0x2d   :  { %1181 = vmatpush.bf16.msrb.mxu3 %v2746_v4  ;;  %1118 = vmatmul.bf16.vlgmr.msra.gmra.mxu2 %v3837_v43  ;;  %v3264_v56 = vld [vmem:[%s4993_s0 + $0x324] sm:$0xf0]  ;;  %v2713_v57 = vld [vmem:[%s4993_s0 + $0x3a0] sm:$0xf]  ;;  %v2577_v62 = vld [vmem:[%s4993_s0 + $0x290] sm:$0xf]  ;;  %v2586_v0 = vor.u32 %v3248_v54, %v2585_v52  ;;  %v2514_v12 = vor.u32 %v3230_v61, %v2513_v59 }
  0x2e   :  { %1140 = vmatpush.bf16.msrb.mxu0 %v2546_v9  ;;  %1132 = vmatmul.bf16.vlgmr.msra.gmra.mxu3 %v3839_v45  ;;  %v3280_v58 = vld [vmem:[%s4993_s0 + $0x3a4] sm:$0xf0]  ;;  %v3246_v63 = vld [vmem:[%s4993_s0 + $0x294] sm:$0xf0]  ;;  %v2650_v2 = vor.u32 %v3264_v56, %v2649_v55  ;;  %v2641_v3 = vld [vmem:[%s4993_s0 + $0x310] sm:$0xf] }
  0x2f   :  { %1154 = vmatpush.bf16.msrb.mxu1 %v2610_v13  ;;  %v3262_v4 = vld [vmem:[%s4993_s0 + $0x314] sm:$0xf0]  ;;  %vm213_vm0 = vcmp.lt.s32.totalorder %v212_v47, 1000  ;;  %v2714_v5 = vor.u32 %v3280_v58, %v2713_v57  ;;  %v2705_v6 = vld [vmem:[%s4993_s0 + $0x390] sm:$0xf] }
  0x30   :  { %1168 = vmatpush.bf16.msrb.mxu2 %v2674_v14  ;;  %v3278_v7 = vld [vmem:[%s4993_s0 + $0x394] sm:$0xf0]  ;;  %v2505_v9 = vld [vmem:[%s4993_s0 + $0x200] sm:$0xf]  ;;  %v3228_v10 = vld [vmem:[%s4993_s0 + $0x204] sm:$0xf0]  ;;  %v2642_v19 = vor.u32 %v3262_v4, %v2641_v3 }
  0x31   :  { %1182 = vmatpush.bf16.msrb.mxu3 %v2738_v18  ;;  %v2213_v8 = vld [vmem:[%s5001_s8 + $0x18] sm:$0xf]  ;;  %v2214_v11 = vld [vmem:[%s5001_s8 + $0x1c] sm:$0xf]  ;;  %v2569_v13 = vld [vmem:[%s4993_s0 + $0x280] sm:$0xf]  ;;  %v2578_v18 = vor.u32 %v3246_v63, %v2577_v62  ;;  %v2706_v23 = vor.u32 %v3278_v7, %v2705_v6  ;;  %v2506_v33 = vor.u32 %v3228_v10, %v2505_v9 }
  0x32   :  { %1141 = vmatpush.bf16.msrb.mxu0 %v2538_v25  ;;  %196 = vst [vmem:[#allocation7 + $0x18] sm:$0xf] %v2213_v8  ;;  %v3244_v14 = vld [vmem:[%s4993_s0 + $0x284] sm:$0xf0]  ;;  %v2633_v15 = vld [vmem:[%s4993_s0 + $0x300] sm:$0xf]  ;;  %v208_v17 = vunpack.c.l.bf16 %v2214_v11 }
  0x33   :  { %1155 = vmatpush.bf16.msrb.mxu1 %v2602_v31  ;;  %v3260_v16 = vld [vmem:[%s4993_s0 + $0x304] sm:$0xf0]  ;;  %v2697_v20 = vld [vmem:[%s4993_s0 + $0x380] sm:$0xf]  ;;  %v3177_v22 = vld [vmem:[%s4993_s0 + $0x74] sm:$0xf] }
  0x34   :  { %1169 = vmatpush.bf16.msrb.mxu2 %v2666_v32  ;;  %v3276_v21 = vld [vmem:[%s4993_s0 + $0x384] sm:$0xf0]  ;;  %v2307_v24 = vld [vmem:[%s4993_s0 + $0x78] sm:$0xf0]  ;;  %v3193_v25 = vld [vmem:[%s4993_s0 + $0xf4] sm:$0xf]  ;;  %v214_v28 = vsel %vm213_vm0, %v208_v17, %v3509_v1  ;;  %v2634_v37 = vor.u32 %v3260_v16, %v2633_v15 }
  0x35   :  { %1183 = vmatpush.bf16.msrb.mxu3 %v2730_v36  ;;  %v2371_v27 = vld [vmem:[%s4993_s0 + $0xf8] sm:$0xf0]  ;;  %v3209_v30 = vld [vmem:[%s4993_s0 + $0x174] sm:$0xf]  ;;  %v216_v32 = vpack.c.bf16 0.0, %v214_v28  ;;  %v2570_v36 = vor.u32 %v3244_v14, %v2569_v13  ;;  %v2698_v40 = vor.u32 %v3276_v21, %v2697_v20  ;;  %v2310_v41 = vor.u32 %v3177_v22, %v2307_v24 }
  0x36   :  { %1142 = vmatpush.bf16.msrb.mxu0 %v2530_v44  ;;  %v2435_v31 = vld [vmem:[%s4993_s0 + $0x178] sm:$0xf0]  ;;  %v3225_v34 = vld [vmem:[%s4993_s0 + $0x1f4] sm:$0xf]  ;;  %v3161_v1 = vld [vmem:[#allocation7 + $0x2c] sm:$0xf0]  ;;  %v2374_v47 = vor.u32 %v3193_v25, %v2371_v27 }
  0x37   :  { %1156 = vmatpush.bf16.msrb.mxu1 %v2594_v48  ;;  %v2499_v35 = vld [vmem:[%s4993_s0 + $0x1f8] sm:$0xf0]  ;;  %v2233_v38 = vld [vmem:[#allocation7 + $0x10] sm:$0xf]  ;;  %v3162_v39 = vld [vmem:[#allocation7 + $0x34] sm:$0xf0]  ;;  %v2438_v48 = vor.u32 %v3209_v30, %v2435_v31 }
  0x38   :  { %1170 = vmatpush.bf16.msrb.mxu2 %v2658_v49  ;;  %219 = vst [vmem:[#allocation7 + $0x1c] sm:$0xf] %v216_v32  ;;  %v3157_v44 = vld [vmem:[#allocation7 + $0x14] sm:$0xf]  ;;  %v3175_v49 = vld [vmem:[%s4993_s0 + $0x64] sm:$0xf]  ;;  %v2502_v51 = vor.u32 %v3225_v34, %v2499_v35  ;;  %v3956_v52 = vor.u32 %v3161_v1, %v2233_v38 }
  0x39   :  { %1184 = vmatpush.bf16.msrb.mxu3 %v2722_v53  ;;  %v2241_v42 = vld [vmem:[#allocation7 + $0x18] sm:$0xf]  ;;  %v2235_v46 = vld [vmem:[#allocation7 + $0x30] sm:$0xf0]  ;;  %v2299_v50 = vld [vmem:[%s4993_s0 + $0x68] sm:$0xf0] }
  0x3a   :  { %1143 = vmatpush.bf16.msrb.mxu0 %v2522_v60  ;;  %v3191_v53 = vld [vmem:[%s4993_s0 + $0xe4] sm:$0xf]  ;;  %v2363_v54 = vld [vmem:[%s4993_s0 + $0xe8] sm:$0xf0]  ;;  %v3967_v56 = vor.u32 %v3162_v39, %v2241_v42  ;;  %v3969_v57 = vor.u32 %v3157_v44, %v2235_v46  ;;  %v2243_v61 = vld [vmem:[#allocation7 + $0x38] sm:$0xf0]  ;;  %v2302_v62 = vor.u32 %v3175_v49, %v2299_v50 }
  0x3b   :  { %1157 = vmatpush.bf16.msrb.mxu1 %v2586_v0  ;;  %v3207_v55 = vld [vmem:[%s4993_s0 + $0x164] sm:$0xf]  ;;  %v2427_v58 = vld [vmem:[%s4993_s0 + $0x168] sm:$0xf0]  ;;  %v2366_v63 = vor.u32 %v3191_v53, %v2363_v54  ;;  %v3173_v0 = vld [vmem:[%s4993_s0 + $0x54] sm:$0xf] }
  0x3c   :  { %1171 = vmatpush.bf16.msrb.mxu2 %v2650_v2  ;;  %v3223_v59 = vld [vmem:[%s4993_s0 + $0x1e4] sm:$0xf]  ;;  %v2491_v60 = vld [vmem:[%s4993_s0 + $0x1e8] sm:$0xf0]  ;;  %v2291_v2 = vld [vmem:[%s4993_s0 + $0x58] sm:$0xf0] }
  0x3d   :  { %1185 = vmatpush.bf16.msrb.mxu3 %v2714_v5  ;;  %v3189_v3 = vld [vmem:[%s4993_s0 + $0xd4] sm:$0xf]  ;;  %v2430_v5 = vor.u32 %v3207_v55, %v2427_v58  ;;  %v2494_v6 = vor.u32 %v3223_v59, %v2491_v60  ;;  %v2355_v7 = vld [vmem:[%s4993_s0 + $0xd8] sm:$0xf0]  ;;  %v2294_v13 = vor.u32 %v3173_v0, %v2291_v2  ;;  %v3171_v15 = vld [vmem:[%s4993_s0 + $0x44] sm:$0xf] }
  0x3e   :  { %1144 = vmatpush.bf16.msrb.mxu0 %v2514_v12  ;;  %v3205_v8 = vld [vmem:[%s4993_s0 + $0x154] sm:$0xf]  ;;  %v2419_v10 = vld [vmem:[%s4993_s0 + $0x158] sm:$0xf0]  ;;  %v2358_v14 = vor.u32 %v3189_v3, %v2355_v7  ;;  %v2283_v16 = vld [vmem:[%s4993_s0 + $0x48] sm:$0xf0] }
  0x3f   :  { %1158 = vmatpush.bf16.msrb.mxu1 %v2578_v18  ;;  %v3158_v4 = vld [vmem:[#allocation7 + $0x1c] sm:$0xf]  ;;  %v3221_v11 = vld [vmem:[%s4993_s0 + $0x1d4] sm:$0xf]  ;;  %v2422_v17 = vor.u32 %v3205_v8, %v2419_v10  ;;  %v2347_v20 = vld [vmem:[%s4993_s0 + $0xc8] sm:$0xf0]  ;;  %v2286_v25 = vor.u32 %v3171_v15, %v2283_v16 }
  0x40   :  { %1172 = vmatpush.bf16.msrb.mxu2 %v2642_v19  ;;  %v3998_v9 = vor.u32 %v3158_v4, %v2243_v61  ;;  %v2483_v12 = vld [vmem:[%s4993_s0 + $0x1d8] sm:$0xf0]  ;;  %v3187_v19 = vld [vmem:[%s4993_s0 + $0xc4] sm:$0xf]  ;;  %v2411_v22 = vld [vmem:[%s4993_s0 + $0x148] sm:$0xf0] }
  0x41   :  { %1186 = vmatpush.bf16.msrb.mxu3 %v2706_v23  ;;  %v2486_v18 = vor.u32 %v3221_v11, %v2483_v12  ;;  %v3203_v21 = vld [vmem:[%s4993_s0 + $0x144] sm:$0xf]  ;;  %v2475_v24 = vld [vmem:[%s4993_s0 + $0x1c8] sm:$0xf0]  ;;  %v2350_v27 = vor.u32 %v3187_v19, %v2347_v20  ;;  %v3169_v28 = vld [vmem:[%s4993_s0 + $0x34] sm:$0xf] }
  0x42   :  { %1145 = vmatpush.bf16.msrb.mxu0 %v2506_v33  ;;  %v3219_v23 = vld [vmem:[%s4993_s0 + $0x1c4] sm:$0xf]  ;;  %v2275_v30 = vld [vmem:[%s4993_s0 + $0x38] sm:$0xf0]  ;;  %v2414_v31 = vor.u32 %v3203_v21, %v2411_v22  ;;  %v3185_v33 = vld [vmem:[%s4993_s0 + $0xb4] sm:$0xf] }
  0x43   :  { %1159 = vmatpush.bf16.msrb.mxu1 %v2570_v36  ;;  %v2478_v32 = vor.u32 %v3219_v23, %v2475_v24  ;;  %v2339_v34 = vld [vmem:[%s4993_s0 + $0xb8] sm:$0xf0]  ;;  %v3201_v35 = vld [vmem:[%s4993_s0 + $0x134] sm:$0xf]  ;;  %v2278_v38 = vor.u32 %v3169_v28, %v2275_v30  ;;  %v3183_v46 = vld [vmem:[%s4993_s0 + $0xa4] sm:$0xf] }
  0x44   :  { %1173 = vmatpush.bf16.msrb.mxu2 %v2634_v37  ;;  %v2403_v1 = vld [vmem:[%s4993_s0 + $0x138] sm:$0xf0]  ;;  %v3217_v36 = vld [vmem:[%s4993_s0 + $0x1b4] sm:$0xf]  ;;  %v2342_v39 = vor.u32 %v3185_v33, %v2339_v34  ;;  %v2395_v49 = vld [vmem:[%s4993_s0 + $0x128] sm:$0xf0] }
  0x45   :  { %1187 = vmatpush.bf16.msrb.mxu3 %v2698_v40  ;;  %1146 = vmatmul.bf16.vlgmr.msrb.gmra.mxu0 %v3956_v52  ;;  %v2467_v37 = vld [vmem:[%s4993_s0 + $0x1b8] sm:$0xf0]  ;;  %v3167_v40 = vld [vmem:[%s4993_s0 + $0x24] sm:$0xf]  ;;  %v2406_v42 = vor.u32 %v3201_v35, %v2403_v1  ;;  %v3165_v55 = vld [vmem:[%s4993_s0 + $0x14] sm:$0xf] }
  0x46   :  { %1194 = vmatpush.bf16.msra.mxu0 %v2310_v41  ;;  %1160 = vmatmul.bf16.vlgmr.msrb.gmra.mxu1 %v3969_v57  ;;  %v2267_v41 = vld [vmem:[%s4993_s0 + $0x28] sm:$0xf0]  ;;  %v2470_v44 = vor.u32 %v3217_v36, %v2467_v37  ;;  %v3215_v50 = vld [vmem:[%s4993_s0 + $0x1a4] sm:$0xf]  ;;  %v2259_v58 = vld [vmem:[%s4993_s0 + $0x18] sm:$0xf0] }
  0x47   :  { %1208 = vmatpush.bf16.msra.mxu1 %v2374_v47  ;;  %1174 = vmatmul.bf16.vlgmr.msrb.gmra.mxu2 %v3967_v56  ;;  %v2331_v47 = vld [vmem:[%s4993_s0 + $0xa8] sm:$0xf0]  ;;  %v2270_v53 = vor.u32 %v3167_v40, %v2267_v41  ;;  %v3181_v61 = vld [vmem:[%s4993_s0 + $0x94] sm:$0xf]  ;;  %v2387_v0 = vld [vmem:[%s4993_s0 + $0x118] sm:$0xf0]  ;;  %v2262_v4 = vor.u32 %v3165_v55, %v2259_v58 }
  0x48   :  { %1222 = vmatpush.bf16.msra.mxu2 %v2438_v48  ;;  %1188 = vmatmul.bf16.vlgmr.msrb.gmra.mxu3 %v3998_v9  ;;  %v3199_v48 = vld [vmem:[%s4993_s0 + $0x124] sm:$0xf]  ;;  %v2334_v54 = vor.u32 %v3183_v46, %v2331_v47  ;;  %v3213_v2 = vld [vmem:[%s4993_s0 + $0x194] sm:$0xf]  ;;  %v2451_v3 = vld [vmem:[%s4993_s0 + $0x198] sm:$0xf0] }
  0x49   :  { %1236 = vmatpush.bf16.msra.mxu3 %v2502_v51  ;;  %v2459_v51 = vld [vmem:[%s4993_s0 + $0x1a8] sm:$0xf0]  ;;  %v2398_v59 = vor.u32 %v3199_v48, %v2395_v49  ;;  %v3179_v8 = vld [vmem:[%s4993_s0 + $0x84] sm:$0xf]  ;;  %v3241_v15 = vld [vmem:[%s4993_s0 + $0x274] sm:$0xf] }
  0x4a   :  { %1195 = vmatpush.bf16.msra.mxu0 %v2302_v62  ;;  %v2462_v60 = vor.u32 %v3215_v50, %v2459_v51  ;;  %v2323_v62 = vld [vmem:[%s4993_s0 + $0x98] sm:$0xf0]  ;;  %v2315_v10 = vld [vmem:[%s4993_s0 + $0x88] sm:$0xf0]  ;;  %v3195_v11 = vld [vmem:[%s4993_s0 + $0x104] sm:$0xf] }
  0x4b   :  { %1209 = vmatpush.bf16.msra.mxu1 %v2366_v63  ;;  %v3197_v63 = vld [vmem:[%s4993_s0 + $0x114] sm:$0xf]  ;;  %v2326_v7 = vor.u32 %v3181_v61, %v2323_v62  ;;  %v2563_v16 = vld [vmem:[%s4993_s0 + $0x278] sm:$0xf0]  ;;  %v2318_v24 = vor.u32 %v3179_v8, %v2315_v10  ;;  %v2555_v33 = vld [vmem:[%s4993_s0 + $0x268] sm:$0xf0] }
  0x4c   :  { %1223 = vmatpush.bf16.msra.mxu2 %v2430_v5  ;;  %v3163_v5 = vld [vmem:[%s4993_s0 + $0x4] sm:$0xf]  ;;  %v2390_v12 = vor.u32 %v3197_v63, %v2387_v0  ;;  %v3257_v19 = vld [vmem:[%s4993_s0 + $0x2f4] sm:$0xf]  ;;  %v2627_v21 = vld [vmem:[%s4993_s0 + $0x2f8] sm:$0xf0] }
  0x4d   :  { %1237 = vmatpush.bf16.msra.mxu3 %v2494_v6  ;;  %v2251_v6 = vld [vmem:[%s4993_s0 + $0x8] sm:$0xf0]  ;;  %v3273_v22 = vld [vmem:[%s4993_s0 + $0x374] sm:$0xf]  ;;  %v2691_v23 = vld [vmem:[%s4993_s0 + $0x378] sm:$0xf0]  ;;  %v2630_v34 = vor.u32 %v3257_v19, %v2627_v21 }
  0x4e   :  { %1196 = vmatpush.bf16.msra.mxu0 %v2294_v13  ;;  %v2454_v13 = vor.u32 %v3213_v2, %v2451_v3  ;;  %v2254_v20 = vor.u32 %v3163_v5, %v2251_v6  ;;  %v2755_v28 = vld [vmem:[%s4993_s0 + $0x3f8] sm:$0xf0]  ;;  %v2694_v35 = vor.u32 %v3273_v22, %v2691_v23  ;;  %v3255_v1 = vld [vmem:[%s4993_s0 + $0x2e4] sm:$0xf]  ;;  %v2619_v37 = vld [vmem:[%s4993_s0 + $0x2e8] sm:$0xf0] }
  0x4f   :  { %1210 = vmatpush.bf16.msra.mxu1 %v2358_v14  ;;  %v2379_v14 = vld [vmem:[%s4993_s0 + $0x108] sm:$0xf0]  ;;  %v3287_v41 = vld [vmem:[%s4993_s0 + $0x3e4] sm:$0xf]  ;;  %v2547_v46 = vld [vmem:[%s4993_s0 + $0x258] sm:$0xf0]  ;;  %v2622_v47 = vor.u32 %v3255_v1, %v2619_v37 }
  0x50   :  { %1224 = vmatpush.bf16.msra.mxu2 %v2422_v17  ;;  %v3211_v17 = vld [vmem:[%s4993_s0 + $0x184] sm:$0xf]  ;;  %v2382_v30 = vor.u32 %v3195_v11, %v2379_v14  ;;  %v3253_v49 = vld [vmem:[%s4993_s0 + $0x2d4] sm:$0xf]  ;;  %v2611_v51 = vld [vmem:[%s4993_s0 + $0x2d8] sm:$0xf0] }
  0x51   :  { %1238 = vmatpush.bf16.msra.mxu3 %v2486_v18  ;;  %v2443_v18 = vld [vmem:[%s4993_s0 + $0x188] sm:$0xf0]  ;;  %v3285_v58 = vld [vmem:[%s4993_s0 + $0x3d4] sm:$0xf]  ;;  %v3251_v62 = vld [vmem:[%s4993_s0 + $0x2c4] sm:$0xf] }
  0x52   :  { %1197 = vmatpush.bf16.msra.mxu0 %v2286_v25  ;;  %v2566_v25 = vor.u32 %v3241_v15, %v2563_v16  ;;  %v3267_v63 = vld [vmem:[%s4993_s0 + $0x344] sm:$0xf]  ;;  %v2667_v0 = vld [vmem:[%s4993_s0 + $0x348] sm:$0xf0]  ;;  %v3233_v5 = vld [vmem:[%s4993_s0 + $0x234] sm:$0xf] }
  0x53   :  { %1211 = vmatpush.bf16.msra.mxu1 %v2350_v27  ;;  %v3289_v27 = vld [vmem:[%s4993_s0 + $0x3f4] sm:$0xf]  ;;  %v3283_v3 = vld [vmem:[%s4993_s0 + $0x3c4] sm:$0xf]  ;;  %v2531_v6 = vld [vmem:[%s4993_s0 + $0x238] sm:$0xf0]  ;;  %v2670_v8 = vor.u32 %v3267_v63, %v2667_v0 }
  0x54   :  { %1225 = vmatpush.bf16.msra.mxu2 %v2414_v31  ;;  %v2446_v31 = vor.u32 %v3211_v17, %v2443_v18  ;;  %v2758_v36 = vor.u32 %v3289_v27, %v2755_v28  ;;  %v3249_v10 = vld [vmem:[%s4993_s0 + $0x2b4] sm:$0xf]  ;;  %v2659_v14 = vld [vmem:[%s4993_s0 + $0x338] sm:$0xf0]  ;;  %v2534_v15 = vor.u32 %v3233_v5, %v2531_v6  ;;  %v3231_v18 = vld [vmem:[%s4993_s0 + $0x224] sm:$0xf] }
  0x55   :  { %1239 = vmatpush.bf16.msra.mxu3 %v2478_v32  ;;  %v3239_v32 = vld [vmem:[%s4993_s0 + $0x264] sm:$0xf]  ;;  %v3281_v16 = vld [vmem:[%s4993_s0 + $0x3b4] sm:$0xf]  ;;  %v2723_v17 = vld [vmem:[%s4993_s0 + $0x3b8] sm:$0xf0] }
  0x56   :  { %1198 = vmatpush.bf16.msra.mxu0 %v2278_v38  ;;  %v3271_v38 = vld [vmem:[%s4993_s0 + $0x364] sm:$0xf]  ;;  %v2558_v40 = vor.u32 %v3239_v32, %v2555_v33  ;;  %v2523_v19 = vld [vmem:[%s4993_s0 + $0x228] sm:$0xf0]  ;;  %v2726_v23 = vor.u32 %v3281_v16, %v2723_v17  ;;  %v3229_v32 = vld [vmem:[%s4993_s0 + $0x214] sm:$0xf] }
  0x57   :  { %1212 = vmatpush.bf16.msra.mxu1 %v2342_v39  ;;  %v2683_v39 = vld [vmem:[%s4993_s0 + $0x368] sm:$0xf0]  ;;  %v3247_v22 = vld [vmem:[%s4993_s0 + $0x2a4] sm:$0xf]  ;;  %v2526_v28 = vor.u32 %v3231_v18, %v2523_v19  ;;  %v2515_v33 = vld [vmem:[%s4993_s0 + $0x218] sm:$0xf0] }
  0x58   :  { %1226 = vmatpush.bf16.msra.mxu2 %v2406_v42  ;;  %v2747_v42 = vld [vmem:[%s4993_s0 + $0x3e8] sm:$0xf0]  ;;  %v2686_v48 = vor.u32 %v3271_v38, %v2683_v39  ;;  %v3245_v1 = vld [vmem:[%s4993_s0 + $0x294] sm:$0xf]  ;;  %v2579_v37 = vld [vmem:[%s4993_s0 + $0x298] sm:$0xf0] }
  0x59   :  { %1240 = vmatpush.bf16.msra.mxu3 %v2470_v44  ;;  %v3237_v44 = vld [vmem:[%s4993_s0 + $0x254] sm:$0xf]  ;;  %v2750_v50 = vor.u32 %v3287_v41, %v2747_v42  ;;  %v2651_v27 = vld [vmem:[%s4993_s0 + $0x328] sm:$0xf0]  ;;  %v2643_v39 = vld [vmem:[%s4993_s0 + $0x318] sm:$0xf0] }
  0x5a   :  { %1199 = vmatpush.bf16.msra.mxu0 %v2270_v53  ;;  %v3269_v53 = vld [vmem:[%s4993_s0 + $0x354] sm:$0xf]  ;;  %v2550_v55 = vor.u32 %v3237_v44, %v2547_v46  ;;  %v2707_v42 = vld [vmem:[%s4993_s0 + $0x398] sm:$0xf0]  ;;  %v3227_v44 = vld [vmem:[%s4993_s0 + $0x204] sm:$0xf] }
  0x5b   :  { %1213 = vmatpush.bf16.msra.mxu1 %v2334_v54  ;;  %v2675_v54 = vld [vmem:[%s4993_s0 + $0x358] sm:$0xf0]  ;;  %v3261_v38 = vld [vmem:[%s4993_s0 + $0x314] sm:$0xf]  ;;  %v2507_v46 = vld [vmem:[%s4993_s0 + $0x208] sm:$0xf0] }
  0x5c   :  { %1227 = vmatpush.bf16.msra.mxu2 %v2398_v59  ;;  %v2739_v59 = vld [vmem:[%s4993_s0 + $0x3d8] sm:$0xf0]  ;;  %v2678_v61 = vor.u32 %v3269_v53, %v2675_v54  ;;  %v3277_v41 = vld [vmem:[%s4993_s0 + $0x394] sm:$0xf]  ;;  %v3259_v53 = vld [vmem:[%s4993_s0 + $0x304] sm:$0xf] }
  0x5d   :  { %1241 = vmatpush.bf16.msra.mxu3 %v2462_v60  ;;  %v2614_v60 = vor.u32 %v3253_v49, %v2611_v51  ;;  %v3243_v49 = vld [vmem:[%s4993_s0 + $0x284] sm:$0xf]  ;;  %v2571_v51 = vld [vmem:[%s4993_s0 + $0x288] sm:$0xf0]  ;;  %v4353_v5 = vld [vmem:[%s4994_s1] sm:$0x3] }
  0x5e   :  { %1200 = vmatpush.bf16.msra.mxu0 %v2262_v4  ;;  %v2731_v4 = vld [vmem:[%s4993_s0 + $0x3c8] sm:$0xf0]  ;;  %v398_v6 = vperm.slane %v4353_v5, 0  ;;  %v3322_v17 = vld [vmem:[%s4995_s2 + $0xf4] sm:$0xf0] }
  0x5f   :  { %1214 = vmatpush.bf16.msra.mxu1 %v2326_v7  ;;  %v2734_v11 = vor.u32 %v3283_v3, %v2731_v4  ;;  %v2635_v54 = vld [vmem:[%s4993_s0 + $0x308] sm:$0xf0]  ;;  %v3305_v18 = vld [vmem:[%s4995_s2 + $0x74] sm:$0xf]  ;;  %v2823_v19 = vld [vmem:[%s4995_s2 + $0x78] sm:$0xf0] }
  0x60   :  { %1228 = vmatpush.bf16.msra.mxu2 %v2390_v12  ;;  %v2595_v12 = vld [vmem:[%s4993_s0 + $0x2b8] sm:$0xf0] }
  0x61   :  { %1242 = vmatpush.bf16.msra.mxu3 %v2454_v13  ;;  %v3265_v13 = vld [vmem:[%s4993_s0 + $0x334] sm:$0xf] }
  0x62   :  { %1201 = vmatpush.bf16.msra.mxu0 %v2254_v20  ;;  %v2598_v20 = vor.u32 %v3249_v10, %v2595_v12  ;;  %v2662_v21 = vor.u32 %v3265_v13, %v2659_v14  ;;  %v2821_v13 = vld [vmem:[%s4995_s2 + $0x70] sm:$0xf]  ;;  %v3306_v14 = vld [vmem:[%s4995_s2 + $0x74] sm:$0xf0] }
  0x63   :  { %1215 = vmatpush.bf16.msra.mxu1 %v2318_v24  ;;  %v2587_v24 = vld [vmem:[%s4993_s0 + $0x2a8] sm:$0xf0]  ;;  %v2822_v16 = vor.u32 %v3306_v14, %v2821_v13  ;;  %v2861_v13 = vld [vmem:[%s4995_s2 + $0xc0] sm:$0xf] }
  0x64   :  { %1229 = vmatpush.bf16.msra.mxu2 %v2382_v30  ;;  %v3279_v30 = vld [vmem:[%s4993_s0 + $0x3a4] sm:$0xf]  ;;  %v2799_v14 = vld [vmem:[%s4995_s2 + $0x48] sm:$0xf0] }
  0x65   :  { %1243 = vmatpush.bf16.msra.mxu3 %v2446_v31  ;;  %1202 = vmatmul.bf16.vlgmr.msra.gmra.mxu0 %v3810_v26  ;;  %v3235_v26 = vld [vmem:[%s4993_s0 + $0x244] sm:$0xf]  ;;  %v2715_v31 = vld [vmem:[%s4993_s0 + $0x3a8] sm:$0xf0] }
  0x66   :  { %1250 = vmatpush.bf16.msrb.mxu0 %v2566_v25  ;;  %1216 = vmatmul.bf16.vlgmr.msra.gmra.mxu1 %v3818_v29  ;;  %v2603_v29 = vld [vmem:[%s4993_s0 + $0x2c8] sm:$0xf0]  ;;  %v3263_v25 = vld [vmem:[%s4993_s0 + $0x324] sm:$0xf] }
  0x67   :  { %1264 = vmatpush.bf16.msrb.mxu1 %v2630_v34  ;;  %1230 = vmatmul.bf16.vlgmr.msra.gmra.mxu2 %v3837_v43  ;;  %v2539_v43 = vld [vmem:[%s4993_s0 + $0x248] sm:$0xf0]  ;;  %v2606_v7 = vor.u32 %v3251_v62, %v2603_v29  ;;  %v2590_v34 = vor.u32 %v3247_v22, %v2587_v24  ;;  %v2826_v22 = vor.u32 %v3305_v18, %v2823_v19  ;;  %v2887_v24 = vld [vmem:[%s4995_s2 + $0xf8] sm:$0xf0]  ;;  %v3315_v19 = vld [vmem:[%s4995_s2 + $0xc4] sm:$0xf] }
  0x68   :  { %1278 = vmatpush.bf16.msrb.mxu2 %v2694_v35  ;;  %1244 = vmatmul.bf16.vlgmr.msra.gmra.mxu3 %v3839_v45  ;;  %v2742_v45 = vor.u32 %v3285_v58, %v2739_v59  ;;  %v2542_v2 = vor.u32 %v3235_v26, %v2539_v43  ;;  %v2654_v35 = vor.u32 %v3263_v25, %v2651_v27  ;;  %v3275_v58 = vld [vmem:[%s4993_s0 + $0x384] sm:$0xf]  ;;  %v2699_v59 = vld [vmem:[%s4993_s0 + $0x388] sm:$0xf0] }
  0x69   :  { %1292 = vmatpush.bf16.msrb.mxu3 %v2758_v36  ;;  %v2718_v36 = vor.u32 %v3279_v30, %v2715_v31  ;;  %v2574_v26 = vor.u32 %v3243_v49, %v2571_v51  ;;  %v2638_v43 = vor.u32 %v3259_v53, %v2635_v54  ;;  %v2813_v30 = vld [vmem:[%s4995_s2 + $0x60] sm:$0xf]  ;;  %v3304_v31 = vld [vmem:[%s4995_s2 + $0x64] sm:$0xf0]  ;;  %v2869_v49 = vld [vmem:[%s4995_s2 + $0xd0] sm:$0xf] }
  0x6a   :  { %1251 = vmatpush.bf16.msrb.mxu0 %v2558_v40  ;;  %v2518_v40 = vor.u32 %v3229_v32, %v2515_v33  ;;  %v2877_v32 = vld [vmem:[%s4995_s2 + $0xe0] sm:$0xf]  ;;  %v2814_v33 = vor.u32 %v3304_v31, %v2813_v30  ;;  %v3318_v53 = vld [vmem:[%s4995_s2 + $0xd4] sm:$0xf0]  ;;  %v3301_v54 = vld [vmem:[%s4995_s2 + $0x54] sm:$0xf] }
  0x6b   :  { %1265 = vmatpush.bf16.msrb.mxu1 %v2622_v47  ;;  %v2582_v47 = vor.u32 %v3245_v1, %v2579_v37  ;;  %v2815_v1 = vld [vmem:[%s4995_s2 + $0x68] sm:$0xf0]  ;;  %v3297_v31 = vld [vmem:[%s4995_s2 + $0x34] sm:$0xf] }
  0x6c   :  { %1279 = vmatpush.bf16.msrb.mxu2 %v2686_v48  ;;  %v2646_v48 = vor.u32 %v3261_v38, %v2643_v39  ;;  %v3319_v39 = vld [vmem:[%s4995_s2 + $0xe4] sm:$0xf] }
  0x6d   :  { %1293 = vmatpush.bf16.msrb.mxu3 %v2750_v50  ;;  %v2710_v50 = vor.u32 %v3277_v41, %v2707_v42 }
  0x6e   :  { %1252 = vmatpush.bf16.msrb.mxu0 %v2550_v55  ;;  %v2510_v55 = vor.u32 %v3227_v44, %v2507_v46 }
  0x6f   :  { %1266 = vmatpush.bf16.msrb.mxu1 %v2614_v60  ;;  %v2702_v60 = vor.u32 %v3275_v58, %v2699_v59  ;;  %v2870_v59 = vor.u32 %v3318_v53, %v2869_v49  ;;  %v2783_v49 = vld [vmem:[%s4995_s2 + $0x28] sm:$0xf0] }
  0x70   :  { %1280 = vmatpush.bf16.msrb.mxu2 %v2678_v61 }
  0x71   :  { %1294 = vmatpush.bf16.msrb.mxu3 %v2742_v45 }
  0x72   :  { %1253 = vmatpush.bf16.msrb.mxu0 %v2542_v2 }
  0x73   :  { %1267 = vmatpush.bf16.msrb.mxu1 %v2606_v7 }
  0x74   :  { %1281 = vmatpush.bf16.msrb.mxu2 %v2670_v8 }
  0x75   :  { %1295 = vmatpush.bf16.msrb.mxu3 %v2734_v11 }
  0x76   :  { %1254 = vmatpush.bf16.msrb.mxu0 %v2534_v15  ;;  %v2885_v15 = vld [vmem:[%s4995_s2 + $0xf0] sm:$0xf] }
  0x77   :  { %1268 = vmatpush.bf16.msrb.mxu1 %v2598_v20  ;;  %v399_v20 = vperm.slane %v4353_v5, 1 }
  0x78   :  { %1282 = vmatpush.bf16.msrb.mxu2 %v2662_v21  ;;  %v2886_v21 = vor.u32 %v3322_v17, %v2885_v15 }
  0x79   :  { %1296 = vmatpush.bf16.msrb.mxu3 %v2726_v23  ;;  %v3321_v23 = vld [vmem:[%s4995_s2 + $0xf4] sm:$0xf] }
  0x7a   :  { %1255 = vmatpush.bf16.msrb.mxu0 %v2526_v28  ;;  %v2890_v25 = vor.u32 %v3321_v23, %v2887_v24 }
  0x7b   :  { %1269 = vmatpush.bf16.msrb.mxu1 %v2590_v34  ;;  %v3320_v34 = vld [vmem:[%s4995_s2 + $0xe4] sm:$0xf0] }
  0x7c   :  { %1283 = vmatpush.bf16.msrb.mxu2 %v2654_v35  ;;  %v3303_v35 = vld [vmem:[%s4995_s2 + $0x64] sm:$0xf]  ;;  %v2878_v37 = vor.u32 %v3320_v34, %v2877_v32  ;;  %v2791_v32 = vld [vmem:[%s4995_s2 + $0x38] sm:$0xf0] }
  0x7d   :  { %1297 = vmatpush.bf16.msrb.mxu3 %v2718_v36  ;;  %v2818_v38 = vor.u32 %v3303_v35, %v2815_v1  ;;  %v2794_v1 = vor.u32 %v3297_v31, %v2791_v32  ;;  %v3307_v31 = vld [vmem:[%s4995_s2 + $0x84] sm:$0xf]  ;;  %v2831_v32 = vld [vmem:[%s4995_s2 + $0x88] sm:$0xf0] }
  0x7e   :  { %1256 = vmatpush.bf16.msrb.mxu0 %v2518_v40  ;;  %v2879_v40 = vld [vmem:[%s4995_s2 + $0xe8] sm:$0xf0] }
  0x7f   :  { %1270 = vmatpush.bf16.msrb.mxu1 %v2582_v47  ;;  %v2882_v42 = vor.u32 %v3319_v39, %v2879_v40  ;;  %v2805_v47 = vld [vmem:[%s4995_s2 + $0x50] sm:$0xf] }
  0x80   :  { %1284 = vmatpush.bf16.msrb.mxu2 %v2646_v48  ;;  %v3302_v48 = vld [vmem:[%s4995_s2 + $0x54] sm:$0xf0] }
  0x81   :  { %1298 = vmatpush.bf16.msrb.mxu3 %v2710_v50  ;;  %v2806_v51 = vor.u32 %v3302_v48, %v2805_v47  ;;  %v3295_v48 = vld [vmem:[%s4995_s2 + $0x24] sm:$0xf] }
  0x82   :  { %1257 = vmatpush.bf16.msrb.mxu0 %v2510_v55  ;;  %v2807_v55 = vld [vmem:[%s4995_s2 + $0x58] sm:$0xf0]  ;;  %v2786_v53 = vor.u32 %v3295_v48, %v2783_v49 }
  0x83   :  { %1271 = vmatpush.bf16.msrb.mxu1 %v2574_v26  ;;  %v2810_v26 = vor.u32 %v3301_v54, %v2807_v55  ;;  %v3311_v54 = vld [vmem:[%s4995_s2 + $0xa4] sm:$0xf]  ;;  %v2847_v55 = vld [vmem:[%s4995_s2 + $0xa8] sm:$0xf0] }
  0x84   :  { %1285 = vmatpush.bf16.msrb.mxu2 %v2638_v43  ;;  %v3317_v43 = vld [vmem:[%s4995_s2 + $0xd4] sm:$0xf] }
  0x85   :  { %1299 = vmatpush.bf16.msrb.mxu3 %v2702_v60  ;;  %1258 = vmatmul.bf16.vlgmr.msrb.gmra.mxu0 %v3956_v52  ;;  %v2871_v60 = vld [vmem:[%s4995_s2 + $0xd8] sm:$0xf0] }
  0x86   :  { %1272 = vmatmul.bf16.vlgmr.msrb.gmra.mxu1 %v3969_v57  ;;  %1548 = vmatpush.bf16.msra.mxu0 %v2822_v16 }
  0x87   :  { %1286 = vmatmul.bf16.vlgmr.msrb.gmra.mxu2 %v3967_v56  ;;  %1562 = vmatpush.bf16.msra.mxu1 %v2886_v21  ;;  %v2863_v21 = vld [vmem:[%s4995_s2 + $0xc8] sm:$0xf0] }
  0x88   :  { %1300 = vmatmul.bf16.vlgmr.msrb.gmra.mxu3 %v3998_v9  ;;  %1576 = vmatpush.bf16.msra.mxu2 %v2826_v22  ;;  %v2866_v24 = vor.u32 %v3315_v19, %v2863_v21 }
  0x89   :  { %1590 = vmatpush.bf16.msra.mxu3 %v2890_v25 }
  0x8a   :  { %1549 = vmatpush.bf16.msra.mxu0 %v2814_v33 }
  0x8b   :  { %1563 = vmatpush.bf16.msra.mxu1 %v2878_v37  ;;  %v2855_v37 = vld [vmem:[%s4995_s2 + $0xb8] sm:$0xf0] }
  0x8c   :  { %1577 = vmatpush.bf16.msra.mxu2 %v2818_v38 }
  0x8d   :  { %1591 = vmatpush.bf16.msra.mxu3 %v2882_v42 }
  0x8e   :  { %1550 = vmatpush.bf16.msra.mxu0 %v2806_v51 }
  0x8f   :  { %1564 = vmatpush.bf16.msra.mxu1 %v2870_v59 }
  0x90   :  { %1578 = vmatpush.bf16.msra.mxu2 %v2810_v26  ;;  %v2850_v26 = vor.u32 %v3311_v54, %v2847_v55 }
  0xa6   :  { %v1091_v61 = vpop.f32.mrf.mxu0 }
  0xa7   :  { %v1105_v62 = vpop.f32.mrf.mxu1  ;;  %v1092_v11 = vadd.f32 %v1091_v61, %v398_v6 }
  0xa9   :  { %v1106_v27 = vadd.f32 %v1105_v62, %v1092_v11  ;;  %v2874_v62 = vor.u32 %v3317_v43, %v2871_v60  ;;  %v3300_v11 = vld [vmem:[%s4995_s2 + $0x44] sm:$0xf0] }
  0xab   :  { %1592 = vmatpush.bf16.msra.mxu3 %v2874_v62  ;;  %v3294_v62 = vld [vmem:[%s4995_s2 + $0x14] sm:$0xf0] }
  0xae   :  { %v4332_v63 = vpop.f32.mrf.mxu0 }
  0xaf   :  { %v4334_v0 = vpop.f32.mrf.mxu1  ;;  %v1094_v61 = vadd.f32 %v4332_v63, %v398_v6  ;;  %v3299_v6 = vld [vmem:[%s4995_s2 + $0x44] sm:$0xf]  ;;  %1593 = vmatpush.bf16.msra.mxu3 %v2866_v24  ;;  %v2765_v24 = vld [vmem:[%s4995_s2] sm:$0xf] }
  0xb0   :  { %v1119_v45 = vpop.f32.mrf.mxu2  ;;  %v2802_v18 = vor.u32 %v3299_v6, %v2799_v14 }
  0xb1   :  { %v4330_v29 = vpop.f32.mrf.mxu3  ;;  %v1120_v44 = vadd.f32 %v1119_v45, %v1106_v27  ;;  %v1108_v22 = vadd.f32 %v4334_v0, %v1094_v61  ;;  %v2789_v27 = vld [vmem:[%s4995_s2 + $0x30] sm:$0xf] }
  0xb2   :  { %1579 = vmatpush.bf16.msra.mxu2 %v2802_v18  ;;  %v2853_v0 = vld [vmem:[%s4995_s2 + $0xb0] sm:$0xf] }
  0xb3   :  { %v1134_v45 = vadd.f32 %v4330_v29, %v1120_v44  ;;  %v3316_v29 = vld [vmem:[%s4995_s2 + $0xc4] sm:$0xf0]  ;;  %v2781_v44 = vld [vmem:[%s4995_s2 + $0x20] sm:$0xf]  ;;  %v2773_v61 = vld [vmem:[%s4995_s2 + $0x10] sm:$0xf] }
  0xb4   :  { %v2862_v17 = vor.u32 %v3316_v29, %v2861_v13  ;;  %v2775_v13 = vld [vmem:[%s4995_s2 + $0x18] sm:$0xf0] }
  0xb6   :  { %1565 = vmatpush.bf16.msra.mxu1 %v2862_v17  ;;  %1580 = vmatpush.bf16.msra.mxu2 %v2794_v1  ;;  %v2839_v17 = vld [vmem:[%s4995_s2 + $0x98] sm:$0xf0] }
  0xb8   :  { %v4336_v2 = vpop.f32.mrf.mxu2 }
  0xb9   :  { %v4338_v3 = vpop.f32.mrf.mxu3  ;;  %v1122_v38 = vadd.f32 %v4336_v2, %v1108_v22  ;;  %v2845_v2 = vld [vmem:[%s4995_s2 + $0xa0] sm:$0xf] }
  0xba   :  { %1581 = vmatpush.bf16.msra.mxu2 %v2786_v53 }
  0xc2   :  { %v4340_v52 = vpop.f32.mrf.mxu0 }
  0xc3   :  { %v4342_v57 = vpop.f32.mrf.mxu1  ;;  %v1148_v25 = vadd.f32 %v4340_v52, %v1134_v45  ;;  %v3314_v52 = vld [vmem:[%s4995_s2 + $0xb4] sm:$0xf0] }
  0xc4   :  { %v2854_v35 = vor.u32 %v3314_v52, %v2853_v0  ;;  %v3291_v0 = vld [vmem:[%s4995_s2 + $0x4] sm:$0xf] }
  0xc6   :  { %1566 = vmatpush.bf16.msra.mxu1 %v2854_v35 }
  0xca   :  { %v4344_v56 = vpop.f32.mrf.mxu2  ;;  %v4348_v4 = vpop.f32.mrf.mxu0 }
  0xcb   :  { %v4346_v9 = vpop.f32.mrf.mxu3  ;;  %v4356_v7 = vpop.f32.mrf.mxu1 }
  0xd2   :  { %v4358_v8 = vpop.f32.mrf.mxu2 }
  0xd3   :  { %v4360_v12 = vpop.f32.mrf.mxu3 }
  0xe2   :  { %v1203_v10 = vpop.f32.mrf.mxu0 }
  0xe3   :  { %v1217_v28 = vpop.f32.mrf.mxu1  ;;  %v1204_v36 = vadd.f32 %v1203_v10, %v399_v20  ;;  %v2797_v10 = vld [vmem:[%s4995_s2 + $0x40] sm:$0xf] }
  0xe4   :  { %v2798_v63 = vor.u32 %v3300_v11, %v2797_v10  ;;  %v2774_v10 = vor.u32 %v3294_v62, %v2773_v61  ;;  %v3293_v11 = vld [vmem:[%s4995_s2 + $0x14] sm:$0xf] }
  0xe5   :  { %v1218_v58 = vadd.f32 %v1217_v28, %v1204_v36  ;;  %v3298_v28 = vld [vmem:[%s4995_s2 + $0x34] sm:$0xf0]  ;;  %v3313_v36 = vld [vmem:[%s4995_s2 + $0xb4] sm:$0xf] }
  0xe6   :  { %1551 = vmatpush.bf16.msra.mxu0 %v2798_v63  ;;  %v2790_v30 = vor.u32 %v3298_v28, %v2789_v27  ;;  %v2858_v40 = vor.u32 %v3313_v36, %v2855_v37 }
  0xe8   :  { %1594 = vmatpush.bf16.msra.mxu3 %v2858_v40 }
  0xea   :  { %v1231_v41 = vpop.f32.mrf.mxu2  ;;  %v1205_v50 = vpop.f32.mrf.mxu0  ;;  %1552 = vmatpush.bf16.msra.mxu0 %v2790_v30 }
  0xeb   :  { %v1245_v46 = vpop.f32.mrf.mxu3  ;;  %v1232_v15 = vadd.f32 %v1231_v41, %v1218_v58  ;;  %v1219_v16 = vpop.f32.mrf.mxu1  ;;  %v1206_v23 = vadd.f32 %v1205_v50, %v399_v20  ;;  %v1162_v41 = vadd.f32 %v4342_v57, %v1148_v25  ;;  %v3312_v57 = vld [vmem:[%s4995_s2 + $0xa4] sm:$0xf0]  ;;  %v1136_v58 = vadd.f32 %v4338_v3, %v1122_v38  ;;  %v2837_v3 = vld [vmem:[%s4995_s2 + $0x90] sm:$0xf] }
  0xec   :  { %v2846_v51 = vor.u32 %v3312_v57, %v2845_v2  ;;  %1595 = vmatpush.bf16.msra.mxu3 %v2850_v26  ;;  %v3292_v25 = vld [vmem:[%s4995_s2 + $0x4] sm:$0xf0] }
  0xed   :  { %v1246_v33 = vadd.f32 %v1245_v46, %v1232_v15  ;;  %v1220_v39 = vadd.f32 %v1219_v16, %v1206_v23  ;;  %v3296_v46 = vld [vmem:[%s4995_s2 + $0x24] sm:$0xf0]  ;;  %v1176_v43 = vadd.f32 %v4344_v56, %v1162_v41  ;;  %v3310_v56 = vld [vmem:[%s4995_s2 + $0x94] sm:$0xf0]  ;;  %v2778_v15 = vor.u32 %v3293_v11, %v2775_v13  ;;  %v3309_v16 = vld [vmem:[%s4995_s2 + $0x94] sm:$0xf] }
  0xee   :  { %v2782_v47 = vor.u32 %v3296_v46, %v2781_v44  ;;  %1567 = vmatpush.bf16.msra.mxu1 %v2846_v51  ;;  %v2838_v14 = vor.u32 %v3310_v56, %v2837_v3  ;;  %v1150_v18 = vadd.f32 %v4348_v4, %v1136_v58  ;;  %v2842_v21 = vor.u32 %v3309_v16, %v2839_v17  ;;  %v2829_v4 = vld [vmem:[%s4995_s2 + $0x80] sm:$0xf]  ;;  %v3338_v16 = vld [vmem:[%s4997_s4 + $0x74] sm:$0xf0]  ;;  %v3017_v17 = vld [vmem:[%s4997_s4 + $0xf0] sm:$0xf] }
  0xef   :  { %v1190_v22 = vadd.f32 %v4346_v9, %v1176_v43  ;;  %1582 = vmatpush.bf16.msra.mxu2 %v2778_v15  ;;  %v2766_v28 = vor.u32 %v3292_v25, %v2765_v24  ;;  %v3308_v9 = vld [vmem:[%s4995_s2 + $0x84] sm:$0xf0]  ;;  %v2953_v15 = vld [vmem:[%s4997_s4 + $0x70] sm:$0xf]  ;;  %v3353_v25 = vld [vmem:[%s4997_s4 + $0xf4] sm:$0xf] }
  0xf0   :  { %1553 = vmatpush.bf16.msra.mxu0 %v2782_v47  ;;  %1596 = vmatpush.bf16.msra.mxu3 %v2842_v21  ;;  %v2830_v30 = vor.u32 %v3308_v9, %v2829_v4  ;;  %v3337_v21 = vld [vmem:[%s4997_s4 + $0x74] sm:$0xf]  ;;  %v3019_v4 = vld [vmem:[%s4997_s4 + $0xf8] sm:$0xf0]  ;;  %v3336_v9 = vld [vmem:[%s4997_s4 + $0x64] sm:$0xf0] }
  0xf2   :  { %v1233_v5 = vpop.f32.mrf.mxu2  ;;  %1568 = vmatpush.bf16.msra.mxu1 %v2838_v14 }
  0xf3   :  { %v1247_v34 = vpop.f32.mrf.mxu3  ;;  %v1234_v59 = vadd.f32 %v1233_v5, %v1220_v39  ;;  %v2767_v5 = vld [vmem:[%s4995_s2 + $0x8] sm:$0xf0] }
  0xf4   :  { %1554 = vmatpush.bf16.msra.mxu0 %v2774_v10  ;;  %v2770_v52 = vor.u32 %v3291_v0, %v2767_v5  ;;  %v3009_v0 = vld [vmem:[%s4997_s4 + $0xe0] sm:$0xf] }
  0xf5   :  { %v1248_v19 = vadd.f32 %v1247_v34, %v1234_v59  ;;  %v2834_v34 = vor.u32 %v3307_v31, %v2831_v32 }
  0xf6   :  { %1569 = vmatpush.bf16.msra.mxu1 %v2830_v30  ;;  %1583 = vmatpush.bf16.msra.mxu2 %v2770_v52  ;;  %v3335_v30 = vld [vmem:[%s4997_s4 + $0x64] sm:$0xf]  ;;  %v2947_v52 = vld [vmem:[%s4997_s4 + $0x68] sm:$0xf0] }
  0xf7   :  { %1597 = vmatpush.bf16.msra.mxu3 %v2834_v34  ;;  %v2950_v32 = vor.u32 %v3335_v30, %v2947_v52  ;;  %v3011_v34 = vld [vmem:[%s4997_s4 + $0xe8] sm:$0xf0]  ;;  %v3342_v52 = vld [vmem:[%s4997_s4 + $0x94] sm:$0xf0] }
  0xf8   :  { %1555 = vmatpush.bf16.msra.mxu0 %v2766_v28  ;;  %v2945_v28 = vld [vmem:[%s4997_s4 + $0x60] sm:$0xf] }
  0xf9   :  { %v2946_v5 = vor.u32 %v3336_v9, %v2945_v28  ;;  %v2905_v9 = vld [vmem:[%s4997_s4 + $0x10] sm:$0xf] }
 0x102   :  { %v1259_v20 = vpop.f32.mrf.mxu0 }
 0x103   :  { %v1260_v42 = vadd.f32 %v1259_v20, %v1246_v33  ;;  %v1273_v50 = vpop.f32.mrf.mxu1  ;;  %v1164_v33 = vadd.f32 %v4356_v7, %v1150_v18  ;;  %v2954_v18 = vor.u32 %v3338_v16, %v2953_v15  ;;  %v3328_v15 = vld [vmem:[%s4997_s4 + $0x24] sm:$0xf0]  ;;  %v2977_v16 = vld [vmem:[%s4997_s4 + $0xa0] sm:$0xf] }
 0x105   :  { %v1274_v60 = vadd.f32 %v1273_v50, %v1260_v42  ;;  %v1178_v37 = vadd.f32 %v4358_v8, %v1164_v33  ;;  %1846 = vmatpush.bf16.msrb.mxu0 %v2954_v18  ;;  %v3351_v33 = vld [vmem:[%s4997_s4 + $0xe4] sm:$0xf]  ;;  %v3344_v18 = vld [vmem:[%s4997_s4 + $0xa4] sm:$0xf0] }
 0x107   :  { %v1192_v46 = vadd.f32 %v4360_v12, %v1178_v37  ;;  %v3001_v37 = vld [vmem:[%s4997_s4 + $0xd0] sm:$0xf] }
 0x109   :  { %1847 = vmatpush.bf16.msrb.mxu0 %v2946_v5  ;;  %v2969_v5 = vld [vmem:[%s4997_s4 + $0x90] sm:$0xf] }
 0x10a   :  { %v1287_v45 = vpop.f32.mrf.mxu2  ;;  %v1261_v6 = vpop.f32.mrf.mxu0 }
 0x10b   :  { %v1288_v63 = vadd.f32 %v1287_v45, %v1274_v60  ;;  %v1301_v29 = vpop.f32.mrf.mxu3  ;;  %v1262_v27 = vadd.f32 %v1261_v6, %v1248_v19  ;;  %v1275_v36 = vpop.f32.mrf.mxu1  ;;  %v3354_v19 = vld [vmem:[%s4997_s4 + $0xf4] sm:$0xf0] }
 0x10d   :  { %v1302_v23 = vadd.f32 %v1301_v29, %v1288_v63  ;;  %v1276_v38 = vadd.f32 %v1275_v36, %v1262_v27  ;;  %v3022_v27 = vor.u32 %v3353_v25, %v3019_v4  ;;  %v3334_v36 = vld [vmem:[%s4997_s4 + $0x54] sm:$0xf0]  ;;  %v3343_v25 = vld [vmem:[%s4997_s4 + $0xa4] sm:$0xf]  ;;  %v2979_v4 = vld [vmem:[%s4997_s4 + $0xa8] sm:$0xf0] }
 0x10f   :  { %v1306_v20 = vpack.c.bf16 %v1302_v23, %v1190_v22  ;;  %v2955_v22 = vld [vmem:[%s4997_s4 + $0x78] sm:$0xf0]  ;;  %v3018_v23 = vor.u32 %v3354_v19, %v3017_v17  ;;  %1888 = vmatpush.bf16.msrb.mxu3 %v3022_v27  ;;  %v3327_v19 = vld [vmem:[%s4997_s4 + $0x24] sm:$0xf]  ;;  %v2982_v27 = vor.u32 %v3343_v25, %v2979_v4 }
 0x110   :  { %v2958_v24 = vor.u32 %v3337_v21, %v2955_v22  ;;  %v2915_v21 = vld [vmem:[%s4997_s4 + $0x28] sm:$0xf0] }
 0x111   :  { %v1308_v35 = vunpack.c.l.bf16 %v1306_v20  ;;  %v1309_v1 = vunpack.c.h.bf16 %v1306_v20  ;;  %1860 = vmatpush.bf16.msrb.mxu1 %v3018_v23  ;;  %v2978_v23 = vor.u32 %v3344_v18, %v2977_v16 }
 0x112   :  { %v1289_v39 = vpop.f32.mrf.mxu2  ;;  %1874 = vmatpush.bf16.msrb.mxu2 %v2958_v24  ;;  %v2918_v24 = vor.u32 %v3327_v19, %v2915_v21 }
 0x113   :  { %v1316_v40 = vmul.f32 1.442695, %v1308_v35  ;;  %v1318_v41 = vmul.f32 1.442695, %v1309_v1  ;;  %v1290_v42 = vadd.f32 %v1289_v39, %v1276_v38  ;;  %v1303_v44 = vpop.f32.mrf.mxu3  ;;  %vm1312_vm1 = vcmp.gt.f32.partialorder %v1308_v35, 0.0 }
 0x114   :  { %vm1313_vm2 = vcmp.gt.f32.partialorder %v1309_v1, 0.0  ;;  %v3014_v35 = vor.u32 %v3351_v33, %v3011_v34  ;;  %v2937_v1 = vld [vmem:[%s4997_s4 + $0x50] sm:$0xf]  ;;  %v3350_v39 = vld [vmem:[%s4997_s4 + $0xd4] sm:$0xf0] }
 0x115   :  { %3427 = vpow2.f32 %v1316_v40  ;;  %v1304_v7 = vadd.f32 %v1303_v44, %v1290_v42  ;;  %vm1336_vm5 = vmpackc.low %vm1313_vm2, %vm1312_vm1  ;;  %v2938_v38 = vor.u32 %v3334_v36, %v2937_v1  ;;  %v3333_v40 = vld [vmem:[%s4997_s4 + $0x54] sm:$0xf]  ;;  %v3002_v42 = vor.u32 %v3350_v39, %v3001_v37 }
 0x116   :  { %3429 = vpow2.f32 %v1318_v41  ;;  %1875 = vmatpush.bf16.msrb.mxu2 %v2950_v32  ;;  %1889 = vmatpush.bf16.msrb.mxu3 %v3014_v35  ;;  %v2939_v41 = vld [vmem:[%s4997_s4 + $0x58] sm:$0xf0]  ;;  %v2970_v1 = vor.u32 %v3342_v52, %v2969_v5  ;;  %v3341_v37 = vld [vmem:[%s4997_s4 + $0x94] sm:$0xf] }
 0x117   :  { %v1307_v2 = vpack.c.bf16 %v1304_v7, %v1192_v46  ;;  %v2942_v44 = vor.u32 %v3333_v40, %v2939_v41  ;;  %v3349_v46 = vld [vmem:[%s4997_s4 + $0xd4] sm:$0xf]  ;;  %v3003_v7 = vld [vmem:[%s4997_s4 + $0xd8] sm:$0xf0]  ;;  %1848 = vmatpush.bf16.msrb.mxu0 %v2938_v38 }
 0x118   :  { %v2907_v32 = vld [vmem:[%s4997_s4 + $0x18] sm:$0xf0] }
 0x119   :  { %v1310_v47 = vunpack.c.l.bf16 %v1307_v2  ;;  %v1311_v57 = vunpack.c.h.bf16 %v1307_v2  ;;  %v2971_v38 = vld [vmem:[%s4997_s4 + $0x98] sm:$0xf0] }
 0x11a   :  { %1876 = vmatpush.bf16.msrb.mxu2 %v2942_v44  ;;  %v2974_v39 = vor.u32 %v3341_v37, %v2971_v38  ;;  %v3324_v44 = vld [vmem:[%s4997_s4 + $0x4] sm:$0xf0]  ;;  %v3369_v37 = vld [vmem:[%s4999_s6 + $0x74] sm:$0xf]  ;;  %v3087_v38 = vld [vmem:[%s4999_s6 + $0x78] sm:$0xf0] }
 0x11b   :  { %v3428_v48 = vpop.eup %3427  ;;  %v1320_v50 = vmul.f32 1.442695, %v1310_v47  ;;  %v1322_v51 = vmul.f32 1.442695, %v1311_v57  ;;  %vm1314_vm3 = vcmp.gt.f32.partialorder %v1310_v47, 0.0  ;;  %vm1315_vm4 = vcmp.gt.f32.partialorder %v1311_v57, 0.0 }
 0x11c   :  { %v3430_v49 = vpop.eup %3429  ;;  %vm1337_vm6 = vmpackc.low %vm1315_vm4, %vm1314_vm3  ;;  %v2929_v47 = vld [vmem:[%s4997_s4 + $0x40] sm:$0xf]  ;;  %v3332_v57 = vld [vmem:[%s4997_s4 + $0x44] sm:$0xf0] }
 0x11d   :  { %v1324_v8 = vpack.c.bf16 %v3430_v49, %v3428_v48  ;;  %3431 = vpow2.f32 %v1320_v50  ;;  %v2993_v48 = vld [vmem:[%s4997_s4 + $0xc0] sm:$0xf]  ;;  %v2930_v49 = vor.u32 %v3332_v57, %v2929_v47  ;;  %v3348_v50 = vld [vmem:[%s4997_s4 + $0xc4] sm:$0xf0]  ;;  %v3323_v47 = vld [vmem:[%s4997_s4 + $0x4] sm:$0xf] }
 0x11e   :  { %3433 = vpow2.f32 %v1322_v51  ;;  %v3331_v51 = vld [vmem:[%s4997_s4 + $0x44] sm:$0xf]  ;;  %v2899_v57 = vld [vmem:[%s4997_s4 + $0x8] sm:$0xf0] }
 0x11f   :  { %v1326_v53 = vunpack.c.l.bf16 %v1324_v8  ;;  %v1327_v54 = vunpack.c.h.bf16 %v1324_v8  ;;  %v2931_v8 = vld [vmem:[%s4997_s4 + $0x48] sm:$0xf0]  ;;  %1849 = vmatpush.bf16.msrb.mxu0 %v2930_v49 }
 0x121   :  { %v2759_v58 = vadd.f32 -1.0, %v1326_v53  ;;  %v2760_v59 = vadd.f32 -1.0, %v1327_v54  ;;  %v2994_v53 = vor.u32 %v3348_v50, %v2993_v48  ;;  %v2934_v54 = vor.u32 %v3331_v51, %v2931_v8  ;;  %v3339_v8 = vld [vmem:[%s4997_s4 + $0x84] sm:$0xf] }
 0x122   :  { %v2902_v51 = vor.u32 %v3323_v47, %v2899_v57  ;;  %v3384_v57 = vld [vmem:[%s4999_s6 + $0xe4] sm:$0xf0] }
 0x123   :  { %v3432_v55 = vpop.eup %3431  ;;  %v1334_v12 = vpack.c.bf16 %v2760_v59, %v2759_v58  ;;  %v2995_v58 = vld [vmem:[%s4997_s4 + $0xc8] sm:$0xf0]  ;;  %v4671_v59 = vld [vmem:[%s4996_s3] sm:$0x3]  ;;  %1877 = vmatpush.bf16.msrb.mxu2 %v2934_v54 }
 0x124   :  { %v3434_v26 = vpop.eup %3433  ;;  %v1375_v22 = vperm.slane %v4671_v59, 1 }
 0x125   :  { %v1325_v43 = vpack.c.bf16 %v3434_v26, %v3432_v55  ;;  %v1338_v45 = vsel %vm1336_vm5, %v1306_v20, %v1334_v12  ;;  %v3352_v20 = vld [vmem:[%s4997_s4 + $0xe4] sm:$0xf0]  ;;  %v3347_v55 = vld [vmem:[%s4997_s4 + $0xc4] sm:$0xf]  ;;  %v3330_v12 = vld [vmem:[%s4997_s4 + $0x34] sm:$0xf0] }
 0x126   :  { %v1380_v11 = vunpack.c.l.b16 %v1338_v45  ;;  %v1381_v13 = vunpack.c.h.b16 %v1338_v45  ;;  %v3010_v31 = vor.u32 %v3352_v20, %v3009_v0  ;;  %v2998_v26 = vor.u32 %v3347_v55, %v2995_v58  ;;  %v2923_v45 = vld [vmem:[%s4997_s4 + $0x38] sm:$0xf0]  ;;  %v3326_v0 = vld [vmem:[%s4997_s4 + $0x14] sm:$0xf0] }
 0x127   :  { %v1328_v60 = vunpack.c.l.bf16 %v1325_v43  ;;  %v1329_v61 = vunpack.c.h.bf16 %v1325_v43  ;;  %v2921_v43 = vld [vmem:[%s4997_s4 + $0x30] sm:$0xf]  ;;  %v2906_v30 = vor.u32 %v3326_v0, %v2905_v9 }
 0x128   :  { %1861 = vmatpush.bf16.msrb.mxu1 %v3010_v31  ;;  %v3325_v31 = vld [vmem:[%s4997_s4 + $0x14] sm:$0xf] }
 0x129   :  { %v2761_v62 = vadd.f32 -1.0, %v1328_v60  ;;  %v2762_v3 = vadd.f32 -1.0, %v1329_v61  ;;  %v2985_v60 = vld [vmem:[%s4997_s4 + $0xb0] sm:$0xf]  ;;  %v2922_v61 = vor.u32 %v3330_v12, %v2921_v43  ;;  %v2910_v36 = vor.u32 %v3325_v31, %v2907_v32 }
 0x12b   :  { %v1335_v10 = vpack.c.bf16 %v2762_v3, %v2761_v62  ;;  %v3346_v62 = vld [vmem:[%s4997_s4 + $0xb4] sm:$0xf0]  ;;  %v3329_v3 = vld [vmem:[%s4997_s4 + $0x34] sm:$0xf]  ;;  %1850 = vmatpush.bf16.msrb.mxu0 %v2922_v61 }
 0x12c   :  { %1862 = vmatpush.bf16.msrb.mxu1 %v3002_v42  ;;  %v2897_v42 = vld [vmem:[%s4997_s4] sm:$0xf] }
 0x12d   :  { %v1339_v56 = vsel %vm1337_vm6, %v1307_v2, %v1335_v10  ;;  %v3006_v2 = vor.u32 %v3349_v46, %v3003_v7  ;;  %v2986_v10 = vor.u32 %v3346_v62, %v2985_v60  ;;  %v2961_v46 = vld [vmem:[%s4997_s4 + $0x80] sm:$0xf]  ;;  %v2898_v7 = vor.u32 %v3324_v44, %v2897_v42  ;;  %v3151_v42 = vld [vmem:[%s4999_s6 + $0xf8] sm:$0xf0] }
 0x12e   :  { %v1382_v63 = vunpack.c.l.b16 %v1339_v56  ;;  %v1383_v29 = vunpack.c.h.b16 %v1339_v56  ;;  %v2926_v56 = vor.u32 %v3329_v3, %v2923_v45 }
 0x12f   :  { %1890 = vmatpush.bf16.msrb.mxu3 %v3006_v2  ;;  %v3340_v2 = vld [vmem:[%s4997_s4 + $0x84] sm:$0xf0] }
 0x130   :  { %v1384_v6 = vpack.c.b16 %v1382_v63, %v1380_v11  ;;  %v1385_v14 = vpack.c.b16 %v1383_v29, %v1381_v13  ;;  %1863 = vmatpush.bf16.msrb.mxu1 %v2994_v53  ;;  %v3345_v11 = vld [vmem:[%s4997_s4 + $0xb4] sm:$0xf]  ;;  %v2987_v13 = vld [vmem:[%s4997_s4 + $0xb8] sm:$0xf0]  ;;  %v1374_v63 = vperm.slane %v4671_v59, 0  ;;  %1878 = vmatpush.bf16.msrb.mxu2 %v2926_v56  ;;  %v2962_v50 = vor.u32 %v3340_v2, %v2961_v46 }
 0x131   :  { %v2990_v29 = vor.u32 %v3345_v11, %v2987_v13  ;;  %v2963_v53 = vld [vmem:[%s4997_s4 + $0x88] sm:$0xf0]  ;;  %v3077_v46 = vld [vmem:[%s4999_s6 + $0x60] sm:$0xf] }
 0x132   :  { %1556 = vmatmul.bf16.vlgmr.msra.gmra.mxu0 %v1384_v6  ;;  %1570 = vmatmul.bf16.vlgmr.msra.gmra.mxu1 %v1385_v14  ;;  %v2966_v54 = vor.u32 %v3339_v8, %v2963_v53  ;;  %v3141_v2 = vld [vmem:[%s4999_s6 + $0xe0] sm:$0xf]  ;;  %v3383_v8 = vld [vmem:[%s4999_s6 + $0xe4] sm:$0xf]  ;;  %v3143_v53 = vld [vmem:[%s4999_s6 + $0xe8] sm:$0xf0] }
 0x133   :  { %1584 = vmatmul.bf16.vlgmr.msra.gmra.mxu2 %v1384_v6  ;;  %1598 = vmatmul.bf16.vlgmr.msra.gmra.mxu3 %v1385_v14  ;;  %v2913_v14 = vld [vmem:[%s4997_s4 + $0x20] sm:$0xf] }
 0x134   :  { %1891 = vmatpush.bf16.msrb.mxu3 %v2998_v26  ;;  %1864 = vmatpush.bf16.msrb.mxu1 %v2986_v10  ;;  %v2914_v17 = vor.u32 %v3328_v15, %v2913_v14 }
 0x135   :  { %1879 = vmatpush.bf16.msrb.mxu2 %v2918_v24 }
 0x136   :  { %1851 = vmatpush.bf16.msrb.mxu0 %v2914_v17 }
 0x138   :  { %1892 = vmatpush.bf16.msrb.mxu3 %v2990_v29  ;;  %1865 = vmatpush.bf16.msrb.mxu1 %v2978_v23 }
 0x139   :  { %1880 = vmatpush.bf16.msrb.mxu2 %v2910_v36  ;;  %v3386_v36 = vld [vmem:[%s4999_s6 + $0xf4] sm:$0xf0] }
 0x13a   :  { %1852 = vmatpush.bf16.msrb.mxu0 %v2906_v30 }
 0x13c   :  { %1893 = vmatpush.bf16.msrb.mxu3 %v2982_v27  ;;  %1866 = vmatpush.bf16.msrb.mxu1 %v2970_v1 }
 0x13d   :  { %1881 = vmatpush.bf16.msrb.mxu2 %v2902_v51 }
 0x13e   :  { %1853 = vmatpush.bf16.msrb.mxu0 %v2898_v7  ;;  %v3368_v7 = vld [vmem:[%s4999_s6 + $0x64] sm:$0xf0] }
 0x13f   :  { %v3078_v47 = vor.u32 %v3368_v7, %v3077_v46  ;;  %v3037_v7 = vld [vmem:[%s4999_s6 + $0x10] sm:$0xf] }
 0x140   :  { %1894 = vmatpush.bf16.msrb.mxu3 %v2974_v39  ;;  %1867 = vmatpush.bf16.msrb.mxu1 %v2962_v50  ;;  %v3142_v50 = vor.u32 %v3384_v57, %v3141_v2  ;;  %v3358_v2 = vld [vmem:[%s4999_s6 + $0x14] sm:$0xf0] }
 0x144   :  { %1895 = vmatpush.bf16.msrb.mxu3 %v2966_v54  ;;  %v3146_v54 = vor.u32 %v3383_v8, %v3143_v53 }
 0x1af   :  { %v1557_v6 = vpop.f32.mrf.mxu0  ;;  %v1571_v33 = vpop.f32.mrf.mxu1 }
 0x1b0   :  { %v1558_v28 = vadd.f32 %v1557_v6, %v1374_v63 }
 0x1b2   :  { %v1572_v40 = vadd.f32 %v1571_v33, %v1558_v28  ;;  %v3085_v33 = vld [vmem:[%s4999_s6 + $0x70] sm:$0xf] }
 0x1b6   :  { %v1585_v20 = vpop.f32.mrf.mxu2  ;;  %v1599_v35 = vpop.f32.mrf.mxu3 }
 0x1b7   :  { %v1586_v34 = vadd.f32 %v1585_v20, %v1375_v22  ;;  %v1559_v49 = vpop.f32.mrf.mxu0  ;;  %v1573_v62 = vpop.f32.mrf.mxu1 }
 0x1b8   :  { %v1560_v26 = vadd.f32 %v1559_v49, %v1374_v63  ;;  %v3079_v49 = vld [vmem:[%s4999_s6 + $0x68] sm:$0xf0] }
 0x1b9   :  { %v1600_v41 = vadd.f32 %v1599_v35, %v1586_v34  ;;  %v3370_v34 = vld [vmem:[%s4999_s6 + $0x74] sm:$0xf0]  ;;  %v3149_v35 = vld [vmem:[%s4999_s6 + $0xf0] sm:$0xf] }
 0x1ba   :  { %v1574_v45 = vadd.f32 %v1573_v62, %v1560_v26  ;;  %v3086_v1 = vor.u32 %v3370_v34, %v3085_v33  ;;  %v3150_v39 = vor.u32 %v3386_v36, %v3149_v35  ;;  %v3133_v26 = vld [vmem:[%s4999_s6 + $0xd0] sm:$0xf]  ;;  %v3360_v33 = vld [vmem:[%s4999_s6 + $0x24] sm:$0xf0]  ;;  %v3109_v34 = vld [vmem:[%s4999_s6 + $0xa0] sm:$0xf] }
 0x1bb   :  { %v1604_v48 = vpack.c.bf16 %v1600_v41, %v1572_v40  ;;  %v3090_v40 = vor.u32 %v3369_v37, %v3087_v38  ;;  %v3385_v41 = vld [vmem:[%s4999_s6 + $0xf4] sm:$0xf]  ;;  %v3359_v36 = vld [vmem:[%s4999_s6 + $0x24] sm:$0xf]  ;;  %v3047_v37 = vld [vmem:[%s4999_s6 + $0x28] sm:$0xf0] }
 0x1bc   :  { %2144 = vmatpush.bf16.msra.mxu0 %v3086_v1  ;;  %v3154_v44 = vor.u32 %v3385_v41, %v3151_v42  ;;  %2158 = vmatpush.bf16.msra.mxu1 %v3150_v39  ;;  %v3376_v1 = vld [vmem:[%s4999_s6 + $0xa4] sm:$0xf0]  ;;  %v3375_v41 = vld [vmem:[%s4999_s6 + $0xa4] sm:$0xf]  ;;  %v3111_v42 = vld [vmem:[%s4999_s6 + $0xa8] sm:$0xf0] }
 0x1bd   :  { %v1606_v55 = vunpack.c.l.bf16 %v1604_v48  ;;  %v1607_v58 = vunpack.c.h.bf16 %v1604_v48  ;;  %2172 = vmatpush.bf16.msra.mxu2 %v3090_v40  ;;  %v3110_v39 = vor.u32 %v3376_v1, %v3109_v34  ;;  %v3050_v40 = vor.u32 %v3359_v36, %v3047_v37 }
 0x1be   :  { %v1587_v43 = vpop.f32.mrf.mxu2  ;;  %v1601_v3 = vpop.f32.mrf.mxu3  ;;  %2186 = vmatpush.bf16.msra.mxu3 %v3154_v44  ;;  %v3114_v44 = vor.u32 %v3375_v41, %v3111_v42 }
 0x1bf   :  { %v1614_v12 = vmul.f32 1.442695, %v1606_v55  ;;  %v1616_v60 = vmul.f32 1.442695, %v1607_v58  ;;  %v1588_v61 = vadd.f32 %v1587_v43, %v1375_v22  ;;  %vm1610_vm7 = vcmp.gt.f32.partialorder %v1606_v55, 0.0 }
 0x1c0   :  { %vm1611_vm8 = vcmp.gt.f32.partialorder %v1607_v58, 0.0  ;;  %2145 = vmatpush.bf16.msra.mxu0 %v3078_v47  ;;  %2159 = vmatpush.bf16.msra.mxu1 %v3142_v50  ;;  %v3069_v55 = vld [vmem:[%s4999_s6 + $0x50] sm:$0xf]  ;;  %v3366_v58 = vld [vmem:[%s4999_s6 + $0x54] sm:$0xf0] }
 0x1c1   :  { %3435 = vpow2.f32 %v1614_v12  ;;  %v1602_v10 = vadd.f32 %v1601_v3, %v1588_v61  ;;  %vm1634_vm11 = vmpackc.low %vm1611_vm8, %vm1610_vm7  ;;  %v3070_v43 = vor.u32 %v3366_v58, %v3069_v55  ;;  %v3382_v12 = vld [vmem:[%s4999_s6 + $0xd4] sm:$0xf0]  ;;  %v3071_v61 = vld [vmem:[%s4999_s6 + $0x58] sm:$0xf0] }
 0x1c2   :  { %3437 = vpow2.f32 %v1616_v60  ;;  %2187 = vmatpush.bf16.msra.mxu3 %v3146_v54  ;;  %v3365_v60 = vld [vmem:[%s4999_s6 + $0x54] sm:$0xf]  ;;  %v3134_v62 = vor.u32 %v3382_v12, %v3133_v26  ;;  %v3101_v47 = vld [vmem:[%s4999_s6 + $0x90] sm:$0xf] }
 0x1c3   :  { %v1605_v56 = vpack.c.bf16 %v1602_v10, %v1574_v45  ;;  %v3074_v3 = vor.u32 %v3365_v60, %v3071_v61  ;;  %v3381_v45 = vld [vmem:[%s4999_s6 + $0xd4] sm:$0xf]  ;;  %v3135_v10 = vld [vmem:[%s4999_s6 + $0xd8] sm:$0xf0] }
 0x1c4   :  { %2146 = vmatpush.bf16.msra.mxu0 %v3070_v43  ;;  %2160 = vmatpush.bf16.msra.mxu1 %v3134_v62  ;;  %v3357_v50 = vld [vmem:[%s4999_s6 + $0x14] sm:$0xf]  ;;  %v3103_v43 = vld [vmem:[%s4999_s6 + $0x98] sm:$0xf0]  ;;  %v3029_v62 = vld [vmem:[%s4999_s6] sm:$0xf] }
 0x1c5   :  { %v1608_v11 = vunpack.c.l.bf16 %v1605_v56  ;;  %v1609_v13 = vunpack.c.h.bf16 %v1605_v56  ;;  %v3373_v26 = vld [vmem:[%s4999_s6 + $0x94] sm:$0xf] }
 0x1c6   :  { %v3106_v12 = vor.u32 %v3373_v26, %v3103_v43 }
 0x1c7   :  { %v3436_v29 = vpop.eup %3435  ;;  %v1618_v14 = vmul.f32 1.442695, %v1608_v11  ;;  %v1620_v15 = vmul.f32 1.442695, %v1609_v13  ;;  %vm1612_vm9 = vcmp.gt.f32.partialorder %v1608_v11, 0.0  ;;  %vm1613_vm10 = vcmp.gt.f32.partialorder %v1609_v13, 0.0 }
 0x1c8   :  { %v3438_v6 = vpop.eup %3437  ;;  %vm1635_vm12 = vmpackc.low %vm1613_vm10, %vm1612_vm9  ;;  %v3061_v11 = vld [vmem:[%s4999_s6 + $0x40] sm:$0xf]  ;;  %v3364_v13 = vld [vmem:[%s4999_s6 + $0x44] sm:$0xf0] }
 0x1c9   :  { %v1622_v59 = vpack.c.bf16 %v3438_v6, %v3436_v29  ;;  %3439 = vpow2.f32 %v1618_v14  ;;  %v3125_v29 = vld [vmem:[%s4999_s6 + $0xc0] sm:$0xf]  ;;  %v3062_v6 = vor.u32 %v3364_v13, %v3061_v11  ;;  %v3380_v14 = vld [vmem:[%s4999_s6 + $0xc4] sm:$0xf0]  ;;  %v3355_v11 = vld [vmem:[%s4999_s6 + $0x4] sm:$0xf] }
 0x1ca   :  { %3441 = vpow2.f32 %v1620_v15  ;;  %v3363_v15 = vld [vmem:[%s4999_s6 + $0x44] sm:$0xf]  ;;  %v3031_v13 = vld [vmem:[%s4999_s6 + $0x8] sm:$0xf0] }
 0x1cb   :  { %v1624_v63 = vunpack.c.l.bf16 %v1622_v59  ;;  %v1625_v16 = vunpack.c.h.bf16 %v1622_v59  ;;  %v3063_v59 = vld [vmem:[%s4999_s6 + $0x48] sm:$0xf0]  ;;  %2147 = vmatpush.bf16.msra.mxu0 %v3062_v6 }
 0x1cd   :  { %v2891_v18 = vadd.f32 -1.0, %v1624_v63  ;;  %v2892_v19 = vadd.f32 -1.0, %v1625_v16  ;;  %v3126_v63 = vor.u32 %v3380_v14, %v3125_v29  ;;  %v3066_v16 = vor.u32 %v3363_v15, %v3063_v59  ;;  %v3371_v59 = vld [vmem:[%s4999_s6 + $0x84] sm:$0xf] }
 0x1ce   :  { %v3034_v15 = vor.u32 %v3355_v11, %v3031_v13 }
 0x1cf   :  { %v3440_v17 = vpop.eup %3439  ;;  %v1632_v23 = vpack.c.bf16 %v2892_v19, %v2891_v18  ;;  %v3127_v18 = vld [vmem:[%s4999_s6 + $0xc8] sm:$0xf0]  ;;  %v4874_v19 = vld [vmem:[%s4998_s5] sm:$0x3]  ;;  %2161 = vmatpush.bf16.msra.mxu1 %v3126_v63 }
 0x1d0   :  { %v3442_v21 = vpop.eup %3441  ;;  %v1673_v38 = vperm.slane %v4874_v19, 1  ;;  %v3095_v63 = vld [vmem:[%s4999_s6 + $0x88] sm:$0xf0] }
 0x1d1   :  { %v1623_v22 = vpack.c.bf16 %v3442_v21, %v3440_v17  ;;  %v1636_v28 = vsel %vm1634_vm11, %v1604_v48, %v1632_v23  ;;  %v3367_v48 = vld [vmem:[%s4999_s6 + $0x64] sm:$0xf]  ;;  %v3362_v23 = vld [vmem:[%s4999_s6 + $0x34] sm:$0xf0] }
 0x1d2   :  { %v1678_v5 = vunpack.c.l.b16 %v1636_v28  ;;  %v1679_v20 = vunpack.c.h.b16 %v1636_v28  ;;  %v3082_v51 = vor.u32 %v3367_v48, %v3079_v49  ;;  %v3379_v17 = vld [vmem:[%s4999_s6 + $0xc4] sm:$0xf]  ;;  %v3055_v28 = vld [vmem:[%s4999_s6 + $0x38] sm:$0xf0]  ;;  %v3038_v48 = vor.u32 %v3358_v2, %v3037_v7  ;;  %v3374_v49 = vld [vmem:[%s4999_s6 + $0x94] sm:$0xf0] }
 0x1d3   :  { %v1626_v24 = vunpack.c.l.bf16 %v1623_v22  ;;  %v1627_v25 = vunpack.c.h.bf16 %v1623_v22  ;;  %v3130_v21 = vor.u32 %v3379_v17, %v3127_v18  ;;  %v3053_v22 = vld [vmem:[%s4999_s6 + $0x30] sm:$0xf]  ;;  %v3102_v55 = vor.u32 %v3374_v49, %v3101_v47 }
 0x1d4   :  { %2173 = vmatpush.bf16.msra.mxu2 %v3082_v51  ;;  %v3039_v51 = vld [vmem:[%s4999_s6 + $0x18] sm:$0xf0] }
 0x1d5   :  { %v2893_v4 = vadd.f32 -1.0, %v1626_v24  ;;  %v2894_v27 = vadd.f32 -1.0, %v1627_v25  ;;  %v3117_v24 = vld [vmem:[%s4999_s6 + $0xb0] sm:$0xf]  ;;  %v3054_v25 = vor.u32 %v3362_v23, %v3053_v22  ;;  %v3042_v58 = vor.u32 %v3357_v50, %v3039_v51 }
 0x1d7   :  { %v1633_v9 = vpack.c.bf16 %v2894_v27, %v2893_v4  ;;  %v3378_v4 = vld [vmem:[%s4999_s6 + $0xb4] sm:$0xf0]  ;;  %v3361_v27 = vld [vmem:[%s4999_s6 + $0x34] sm:$0xf]  ;;  %2148 = vmatpush.bf16.msra.mxu0 %v3054_v25 }
 0x1d8   :  { %2174 = vmatpush.bf16.msra.mxu2 %v3074_v3  ;;  %v3356_v3 = vld [vmem:[%s4999_s6 + $0x4] sm:$0xf0] }
 0x1d9   :  { %v1637_v0 = vsel %vm1635_vm12, %v1605_v56, %v1633_v9  ;;  %v3138_v56 = vor.u32 %v3381_v45, %v3135_v10  ;;  %v3118_v9 = vor.u32 %v3378_v4, %v3117_v24  ;;  %v3093_v45 = vld [vmem:[%s4999_s6 + $0x80] sm:$0xf]  ;;  %v3030_v10 = vor.u32 %v3356_v3, %v3029_v62 }
 0x1da   :  { %v1680_v30 = vunpack.c.l.b16 %v1637_v0  ;;  %v1681_v52 = vunpack.c.h.b16 %v1637_v0  ;;  %v3058_v0 = vor.u32 %v3361_v27, %v3055_v28 }
 0x1db   :  { %2188 = vmatpush.bf16.msra.mxu3 %v3138_v56  ;;  %2162 = vmatpush.bf16.msra.mxu1 %v3118_v9  ;;  %v3372_v56 = vld [vmem:[%s4999_s6 + $0x84] sm:$0xf0] }
 0x1dc   :  { %v1682_v31 = vpack.c.b16 %v1680_v30, %v1678_v5  ;;  %v1683_v32 = vpack.c.b16 %v1681_v52, %v1679_v20  ;;  %2175 = vmatpush.bf16.msra.mxu2 %v3066_v16  ;;  %v3377_v5 = vld [vmem:[%s4999_s6 + $0xb4] sm:$0xf]  ;;  %v3119_v20 = vld [vmem:[%s4999_s6 + $0xb8] sm:$0xf0]  ;;  %v1672_v30 = vperm.slane %v4874_v19, 0  ;;  %v3094_v14 = vor.u32 %v3372_v56, %v3093_v45 }
 0x1dd   :  { %v3122_v52 = vor.u32 %v3377_v5, %v3119_v20  ;;  %v3098_v16 = vor.u32 %v3371_v59, %v3095_v63 }
 0x1de   :  { %1854 = vmatmul.bf16.vlgmr.msrb.gmra.mxu0 %v1682_v31  ;;  %1868 = vmatmul.bf16.vlgmr.msrb.gmra.mxu1 %v1683_v32 }
 0x1df   :  { %1882 = vmatmul.bf16.vlgmr.msrb.gmra.mxu2 %v1682_v31  ;;  %1896 = vmatmul.bf16.vlgmr.msrb.gmra.mxu3 %v1683_v32  ;;  %v3045_v32 = vld [vmem:[%s4999_s6 + $0x20] sm:$0xf] }
 0x1e0   :  { %2189 = vmatpush.bf16.msra.mxu3 %v3130_v21  ;;  %2176 = vmatpush.bf16.msra.mxu2 %v3058_v0  ;;  %v3046_v35 = vor.u32 %v3360_v33, %v3045_v32 }
 0x1e1   :  { %2163 = vmatpush.bf16.msra.mxu1 %v3110_v39 }
 0x1e2   :  { %2149 = vmatpush.bf16.msra.mxu0 %v3046_v35 }
 0x1e4   :  { %2190 = vmatpush.bf16.msra.mxu3 %v3122_v52  ;;  %2177 = vmatpush.bf16.msra.mxu2 %v3050_v40 }
 0x1e5   :  { %2164 = vmatpush.bf16.msra.mxu1 %v3102_v55 }
 0x1e6   :  { %2150 = vmatpush.bf16.msra.mxu0 %v3038_v48 }
 0x1e8   :  { %2191 = vmatpush.bf16.msra.mxu3 %v3114_v44  ;;  %2178 = vmatpush.bf16.msra.mxu2 %v3042_v58 }
 0x1e9   :  { %2165 = vmatpush.bf16.msra.mxu1 %v3094_v14 }
 0x1ea   :  { %2151 = vmatpush.bf16.msra.mxu0 %v3030_v10 }
 0x1ec   :  { %2192 = vmatpush.bf16.msra.mxu3 %v3106_v12  ;;  %2179 = vmatpush.bf16.msra.mxu2 %v3034_v15 }
 0x1f0   :  { %2193 = vmatpush.bf16.msra.mxu3 %v3098_v16 }
 0x25b   :  { %v1855_v31 = vpop.f32.mrf.mxu0  ;;  %v1869_v8 = vpop.f32.mrf.mxu1 }
 0x25c   :  { %v1856_v46 = vadd.f32 %v1855_v31, %v1672_v30 }
 0x25e   :  { %v1870_v60 = vadd.f32 %v1869_v8, %v1856_v46  ;;  %v1968_v8 = vld [vmem:[%s5000_s7] sm:$0x3] }
 0x25f   :  { %v1971_v43 = vperm.slane %v1968_v8, 1 }
 0x262   :  { %v1883_v57 = vpop.f32.mrf.mxu2  ;;  %v1897_v54 = vpop.f32.mrf.mxu3 }
 0x263   :  { %v1884_v53 = vadd.f32 %v1883_v57, %v1673_v38  ;;  %v1857_v6 = vpop.f32.mrf.mxu0  ;;  %v1871_v4 = vpop.f32.mrf.mxu1 }
 0x264   :  { %v1858_v21 = vadd.f32 %v1857_v6, %v1672_v30 }
 0x265   :  { %v1898_v61 = vadd.f32 %v1897_v54, %v1884_v53  ;;  %v1970_v53 = vperm.slane %v1968_v8, 0 }
 0x266   :  { %v1872_v28 = vadd.f32 %v1871_v4, %v1858_v21 }
 0x267   :  { %v1902_v29 = vpack.c.bf16 %v1898_v61, %v1870_v60 }
 0x269   :  { %v1904_v17 = vunpack.c.l.bf16 %v1902_v29  ;;  %v1905_v18 = vunpack.c.h.bf16 %v1902_v29 }
 0x26a   :  { %v1885_v22 = vpop.f32.mrf.mxu2  ;;  %v1899_v27 = vpop.f32.mrf.mxu3 }
 0x26b   :  { %v1912_v23 = vmul.f32 1.442695, %v1904_v17  ;;  %v1914_v24 = vmul.f32 1.442695, %v1905_v18  ;;  %v1886_v25 = vadd.f32 %v1885_v22, %v1673_v38  ;;  %vm1908_vm13 = vcmp.gt.f32.partialorder %v1904_v17, 0.0 }
 0x26c   :  { %vm1909_vm14 = vcmp.gt.f32.partialorder %v1905_v18, 0.0 }
 0x26d   :  { %3443 = vpow2.f32 %v1912_v23  ;;  %v1900_v9 = vadd.f32 %v1899_v27, %v1886_v25  ;;  %vm1932_vm1 = vmpackc.low %vm1909_vm14, %vm1908_vm13 }
 0x26e   :  { %3445 = vpow2.f32 %v1914_v24 }
 0x26f   :  { %v1903_v0 = vpack.c.bf16 %v1900_v9, %v1872_v28 }
 0x271   :  { %v1906_v5 = vunpack.c.l.bf16 %v1903_v0  ;;  %v1907_v20 = vunpack.c.h.bf16 %v1903_v0 }
 0x273   :  { %v3444_v52 = vpop.eup %3443  ;;  %v1916_v32 = vmul.f32 1.442695, %v1906_v5  ;;  %v1918_v33 = vmul.f32 1.442695, %v1907_v20  ;;  %vm1910_vm15 = vcmp.gt.f32.partialorder %v1906_v5, 0.0  ;;  %vm1911_vm0 = vcmp.gt.f32.partialorder %v1907_v20, 0.0 }
 0x274   :  { %v3446_v31 = vpop.eup %3445  ;;  %vm1933_vm2 = vmpackc.low %vm1911_vm0, %vm1910_vm15 }
 0x275   :  { %v1920_v19 = vpack.c.bf16 %v3446_v31, %v3444_v52  ;;  %3447 = vpow2.f32 %v1916_v32 }
 0x276   :  { %3449 = vpow2.f32 %v1918_v33 }
 0x277   :  { %v1922_v30 = vunpack.c.l.bf16 %v1920_v19  ;;  %v1923_v34 = vunpack.c.h.bf16 %v1920_v19 }
 0x279   :  { %v3023_v1 = vadd.f32 -1.0, %v1922_v30  ;;  %v3024_v36 = vadd.f32 -1.0, %v1923_v34 }
 0x27b   :  { %v3448_v35 = vpop.eup %3447  ;;  %v1930_v39 = vpack.c.bf16 %v3024_v36, %v3023_v1 }
 0x27c   :  { %v3450_v37 = vpop.eup %3449 }
 0x27d   :  { %v1921_v38 = vpack.c.bf16 %v3450_v37, %v3448_v35  ;;  %v1934_v46 = vsel %vm1932_vm1, %v1902_v29, %v1930_v39 }
 0x27e   :  { %v1976_v47 = vunpack.c.l.b16 %v1934_v46  ;;  %v1977_v57 = vunpack.c.h.b16 %v1934_v46 }
 0x27f   :  { %v1924_v40 = vunpack.c.l.bf16 %v1921_v38  ;;  %v1925_v41 = vunpack.c.h.bf16 %v1921_v38 }
 0x281   :  { %v3025_v42 = vadd.f32 -1.0, %v1924_v40  ;;  %v3026_v44 = vadd.f32 -1.0, %v1925_v41 }
 0x283   :  { %v1931_v7 = vpack.c.bf16 %v3026_v44, %v3025_v42 }
 0x285   :  { %v1935_v2 = vsel %vm1933_vm2, %v1903_v0, %v1931_v7 }
 0x286   :  { %v1978_v48 = vunpack.c.l.b16 %v1935_v2  ;;  %v1979_v49 = vunpack.c.h.b16 %v1935_v2 }
 0x288   :  { %v1980_v50 = vpack.c.b16 %v1978_v48, %v1976_v47  ;;  %v1981_v51 = vpack.c.b16 %v1979_v49, %v1977_v57 }
 0x28a   :  { %2152 = vmatmul.bf16.vlgmr.msra.gmra.mxu0 %v1980_v50  ;;  %2166 = vmatmul.bf16.vlgmr.msra.gmra.mxu1 %v1981_v51 }
 0x28b   :  { %2180 = vmatmul.bf16.vlgmr.msra.gmra.mxu2 %v1980_v50  ;;  %2194 = vmatmul.bf16.vlgmr.msra.gmra.mxu3 %v1981_v51 }
 0x307   :  { %v2153_v54 = vpop.f32.mrf.mxu0  ;;  %v2167_v55 = vpop.f32.mrf.mxu1 }
 0x308   :  { %v2154_v58 = vadd.f32 %v2153_v54, %v1970_v53 }
 0x30a   :  { %v2168_v26 = vadd.f32 %v2167_v55, %v2154_v58 }
 0x30c   :  { %2200 = vst [vmem:[%s5003_s10] sm:$0xff] %v2168_v26 }
 0x30e   :  { %v2181_v12 = vpop.f32.mrf.mxu2  ;;  %v2195_v60 = vpop.f32.mrf.mxu3 }
 0x30f   :  { %v2182_v61 = vadd.f32 %v2181_v12, %v1971_v43  ;;  %v2155_v62 = vpop.f32.mrf.mxu0  ;;  %v2169_v10 = vpop.f32.mrf.mxu1 }
 0x310   :  { %v2156_v3 = vadd.f32 %v2155_v62, %v1970_v53 }
 0x311   :  { %v2196_v45 = vadd.f32 %v2195_v60, %v2182_v61 }
 0x312   :  { %v2170_v56 = vadd.f32 %v2169_v10, %v2156_v3 }
 0x313   :  { %2201 = vst [vmem:[%s5003_s10 + $0x8] sm:$0xff] %v2196_v45 }
 0x314   :  { %2202 = vst [vmem:[%s5003_s10 + $0x10] sm:$0xff] %v2170_v56 }
 0x316   :  { %v2183_v11 = vpop.f32.mrf.mxu2  ;;  %v2197_v29 = vpop.f32.mrf.mxu3 }
 0x317   :  { %v2184_v13 = vadd.f32 %v2183_v11, %v1971_v43 }
 0x319   :  { %v2198_v6 = vadd.f32 %v2197_v29, %v2184_v13 }
 0x31b   :  { %2203 = vst [vmem:[%s5003_s10 + $0x18] sm:$0xff] %v2198_v6 }

</bundles_post_ra>
